<compile_context>
chip_gen: v6e
topology: v6e:2x2x1
jax: 0.10.0
libtpu: 0.0.40
codegen_flags: <defaults>
</compile_context>

<pallas_src>
import functools

import jax
import jax.numpy as jnp
from jax.experimental import pallas as pl
from jax.experimental.pallas import tpu as pltpu


# ---------------------------------------------------------------------------
# Kernel 1: fused depthwise-3x3 + pointwise-1x1 conv for one (batch, row-tile)
#           block, plus per-tile BatchNorm partial statistics.
# ---------------------------------------------------------------------------
def _dwsep_conv_kernel(x_ref, w_ref, b_ref, y_ref, psum_ref, psumsq_ref,
                       *, TH, W, C_in, C_out):
    # x_ref     : (1, TH+2, W+2, C_in)  zero-padded input row tile (f32)
    # w_ref     : (9, C_in, C_out)      fused depthwise*pointwise weights
    # b_ref     : (1, C_out)            fused bias (f32)
    # y_ref     : (1, TH*W, C_out)      conv output (pre-BN), f32
    # psum_ref  : (1, 1, C_out)         sum of y over this tile
    # psumsq_ref: (1, 1, C_out)         sum of y^2 over this tile
    xp = x_ref[0].astype(w_ref.dtype)      # (TH+2, W+2, C_in), maybe bf16

    # Nine shifted taps, each a (TH*W, C_in) x (C_in, C_out) MXU matmul with
    # f32 accumulation.  With production-sized C_in (>=128) every tap already
    # fills an MXU pass; the depthwise work runs entirely on the MXU instead of
    # a VPU multiply-accumulate loop.
    acc = jnp.zeros((TH * W, C_out), jnp.float32)
    for kh in range(3):
        for kw in range(3):
            tap = xp[kh:kh + TH, kw:kw + W, :].reshape(TH * W, C_in)
            acc = acc + jnp.dot(tap, w_ref[kh * 3 + kw],
                                preferred_element_type=jnp.float32)
    y = acc + b_ref[0]                     # (TH*W, C_out) f32

    y_ref[0] = y
    # Partial BatchNorm statistics; reduced across tiles outside the kernel.
    psum_ref[0] = jnp.sum(y, axis=0, keepdims=True)
    psumsq_ref[0] = jnp.sum(y * y, axis=0, keepdims=True)


# ---------------------------------------------------------------------------
# Kernel 2: blocked BatchNorm apply (precomputed per-channel scale/shift) + ReLU.
#           Operates on a lane-dense (B, H, W*C_out) view: full 128-lane
#           loads/stores instead of C_out/128 masked ones.
# ---------------------------------------------------------------------------
def _bn_relu_kernel(y_ref, scale_ref, shift_ref, o_ref):
    # y_ref/o_ref: (1, TH, W*C_out)   scale_ref/shift_ref: (1, W*C_out)
    o_ref[...] = jnp.maximum(y_ref[...] * scale_ref[0] + shift_ref[0], 0.0)


# ---------------------------------------------------------------------------
# Wrapper
# ---------------------------------------------------------------------------
def _pick_row_tile(H, W, C_in, max_block_bytes=2 << 20):
    """Row-tile height: multiple of 8, divides H, >=2 tiles, bounded VMEM block."""
    if H % 8 != 0:
        return H                       # single full-height tile (full-dim escape)
    th = 8
    while (H % (th * 2) == 0 and th * 2 < H
           and (th * 2 + 2) * (W + 2) * C_in * 4 <= max_block_bytes):
        th *= 2
    return th


def depthwise_separable_conv(x_nchw, params, *, eps=1e-5, use_bf16_matmul=False):
    """x_nchw: (B, C_in, H, W) float32. Returns (B, C_out, H, W) float32.

    use_bf16_matmul=True casts the MXU operands to bf16 (f32 accumulation):
    the recommended fast path on v6e/v7x.  False keeps f32 bit-parity with the
    PyTorch reference conv.
    """
    w_dw, b_dw = params["w_dw"], params["b_dw"]
    w_pw, b_pw = params["w_pw"], params["b_pw"]
    gamma, beta = params["gamma"], params["beta"]

    B, C_in, H, W = x_nchw.shape
    C_out = w_pw.shape[0]

    TH = _pick_row_tile(H, W, C_in)
    HT = H // TH

    # NCHW -> NHWC (channels on lanes), zero-pad the 1-pixel halo and cut into
    # overlapping row tiles so every grid step gets a rectangular block that
    # standard BlockSpec pipelining can stream (costs ~(TH+2)/TH extra input
    # traffic; for very large activations the halo could instead be fetched
    # in-kernel with a manual DMA).
    x = jnp.transpose(x_nchw, (0, 2, 3, 1)).astype(jnp.float32)
    x_pad = jnp.pad(x, ((0, 0), (1, 1), (1, 1), (0, 0)))
    x_tiles = jnp.stack(
        [x_pad[:, t * TH:t * TH + TH + 2] for t in range(HT)], axis=1
    ).reshape(B * HT, TH + 2, W + 2, C_in)

    # Fold depthwise + pointwise into a single weight / bias:
    #   y = sum_t shift_t(x) @ (diag(w_dw[t]) @ w_pw) + (b_dw @ w_pw + b_pw)
    wdw = jnp.transpose(w_dw[:, 0, :, :], (1, 2, 0)).reshape(9, C_in)   # (9, C_in)
    wpw = jnp.transpose(w_pw[:, :, 0, 0], (1, 0)).astype(jnp.float32)   # (C_in, C_out)
    w_fused = wdw[:, :, None].astype(jnp.float32) * wpw[None, :, :]     # (9, C_in, C_out)
    b_fused = (b_dw.astype(jnp.float32) @ wpw + b_pw).reshape(1, C_out)

    compute_dtype = jnp.bfloat16 if use_bf16_matmul else jnp.float32
    w_fused = w_fused.astype(compute_dtype)

    # ---- Kernel 1: fused conv, grid over (batch, row-tiles) ----
    conv_kernel = functools.partial(_dwsep_conv_kernel,
                                    TH=TH, W=W, C_in=C_in, C_out=C_out)
    y, psum, psumsq = pl.pallas_call(
        conv_kernel,
        out_shape=(
            jax.ShapeDtypeStruct((B * HT, TH * W, C_out), jnp.float32),
            jax.ShapeDtypeStruct((B * HT, 1, C_out), jnp.float32),
            jax.ShapeDtypeStruct((B * HT, 1, C_out), jnp.float32),
        ),
        grid_spec=pltpu.PrefetchScalarGridSpec(
            num_scalar_prefetch=0,
            grid=(B, HT),
            in_specs=[
                pl.BlockSpec((1, TH + 2, W + 2, C_in),
                             lambda b, h: (b * HT + h, 0, 0, 0)),
                pl.BlockSpec((9, C_in, C_out), lambda b, h: (0, 0, 0)),
                pl.BlockSpec((1, C_out), lambda b, h: (0, 0)),
            ],
            out_specs=(
                pl.BlockSpec((1, TH * W, C_out), lambda b, h: (b * HT + h, 0, 0)),
                pl.BlockSpec((1, 1, C_out), lambda b, h: (b * HT + h, 0, 0)),
                pl.BlockSpec((1, 1, C_out), lambda b, h: (b * HT + h, 0, 0)),
            ),
        ),
        compiler_params=pltpu.CompilerParams(
            dimension_semantics=("parallel", "parallel")),
    )(x_tiles, w_fused, b_fused)

    # ---- Tiny XLA reduction: batch statistics -> per-channel scale/shift ----
    n = B * H * W
    s = jnp.sum(psum, axis=(0, 1))                      # (C_out,)
    ss = jnp.sum(psumsq, axis=(0, 1))                   # (C_out,)
    mean = s / n
    var = jnp.maximum(ss / n - mean * mean, 0.0)        # biased (training) variance
    scale = gamma.astype(jnp.float32) * jax.lax.rsqrt(var + eps)
    shift = beta.astype(jnp.float32) - mean * scale
    # Tile per-channel scale/shift across W so the BN kernel works directly on
    # the lane-dense (B, H, W*C_out) view (flat index = w*C_out + c).
    scale_t = jnp.tile(scale, W).reshape(1, W * C_out)
    shift_t = jnp.tile(shift, W).reshape(1, W * C_out)

    # Row-major-compatible (free) reshape to the lane-dense view.
    y_flat = y.reshape(B, H, W * C_out)

    # ---- Kernel 2: blocked BN apply + ReLU, in place over the conv output ----
    out = pl.pallas_call(
        _bn_relu_kernel,
        out_shape=jax.ShapeDtypeStruct((B, H, W * C_out), jnp.float32),
        grid_spec=pltpu.PrefetchScalarGridSpec(
            num_scalar_prefetch=0,
            grid=(B, HT),
            in_specs=[
                pl.BlockSpec((1, TH, W * C_out), lambda b, h: (b, h, 0)),
                pl.BlockSpec((1, W * C_out), lambda b, h: (0, 0)),
                pl.BlockSpec((1, W * C_out), lambda b, h: (0, 0)),
            ],
            out_specs=pl.BlockSpec((1, TH, W * C_out), lambda b, h: (b, h, 0)),
        ),
        compiler_params=pltpu.CompilerParams(
            dimension_semantics=("parallel", "parallel")),
        input_output_aliases={0: 0},
    )(y_flat, scale_t, shift_t)

    # (B, H, W*C_out) -> (B, H, W, C_out) -> NCHW
    return jnp.transpose(out.reshape(B, H, W, C_out), (0, 3, 1, 2))


def init_params(key, in_channels, out_channels):
    """Deterministic parameter init matching PyTorch shapes."""
    k1, k2, k3, k4 = jax.random.split(key, 4)
    # Conv2d(in, in, 3, padding=1, groups=in): weight (in, 1, 3, 3), bias (in,)
    w_dw = jax.random.normal(k1, (in_channels, 1, 3, 3), jnp.float32) * 0.2
    b_dw = jax.random.normal(k2, (in_channels,), jnp.float32) * 0.1
    # Conv2d(in, out, 1): weight (out, in, 1, 1), bias (out,)
    w_pw = jax.random.normal(k3, (out_channels, in_channels, 1, 1), jnp.float32) * 0.2
    b_pw = jax.random.normal(k4, (out_channels,), jnp.float32) * 0.1
    # BatchNorm2d(out): gamma=1, beta=0 (PyTorch default init)
    gamma = jnp.ones((out_channels,), jnp.float32)
    beta = jnp.zeros((out_channels,), jnp.float32)
    return dict(w_dw=w_dw, b_dw=b_dw, w_pw=w_pw, b_pw=b_pw, gamma=gamma, beta=beta)


if __name__ == "__main__":
    key = jax.random.PRNGKey(0)
    kx, kp = jax.random.split(key)

    B, C_in, H, W = 2, 4, 16, 16
    C_out = 8

    x = jax.random.normal(kx, (B, C_in, H, W), jnp.float32)
    params = init_params(kp, C_in, C_out)

    # bf16 MXU fast path (f32 accumulation) — recommended on v6e/v7x; pass
    # use_bf16_matmul=False for f32 bit-parity with the PyTorch reference.
    fn = jax.jit(functools.partial(depthwise_separable_conv, use_bf16_matmul=True))
    out = jax.block_until_ready(fn(x, params))

    assert out.shape == (B, C_out, H, W), out.shape
    assert out.dtype == jnp.float32
    print("KERNEL_OK")
</pallas_src>

<mosaic_0001>
module attributes {stable_mosaic.version = 11 : i64} {
  func.func @_dwsep_conv_kernel(%arg0: i32, %arg1: i32, %arg2: memref<1x10x18x4xf32, #tpu.memory_space<vmem>>, %arg3: memref<9x4x8xbf16, #tpu.memory_space<vmem>>, %arg4: memref<1x8xf32, #tpu.memory_space<vmem>>, %arg5: memref<1x128x8xf32, #tpu.memory_space<vmem>>, %arg6: memref<1x1x8xf32, #tpu.memory_space<vmem>>, %arg7: memref<1x1x8xf32, #tpu.memory_space<vmem>>) attributes {dimension_semantics = [#tpu.dimension_semantics<parallel>, #tpu.dimension_semantics<parallel>], iteration_bounds = array<i64: 2, 2>, scalar_prefetch = 0 : i64, scratch_operands = 0 : i64, tpu.core_type = #tpu.core_type<tc>, window_params = [{transform_indices = @transform_0, window_bounds = array<i64: 1, 10, 18, 4>}, {pipeline_mode = #tpu.pipeline_mode<synchronous>, transform_indices = @transform_1, window_bounds = array<i64: 9, 4, 8>}, {pipeline_mode = #tpu.pipeline_mode<synchronous>, transform_indices = @transform_2, window_bounds = array<i64: 1, 8>}, {transform_indices = @transform_3, window_bounds = array<i64: 1, 128, 8>}, {transform_indices = @transform_4, window_bounds = array<i64: 1, 1, 8>}, {transform_indices = @transform_5, window_bounds = array<i64: 1, 1, 8>}]} {
    %c0 = arith.constant 0 : index
    %c0_0 = arith.constant 0 : index
    %c0_1 = arith.constant 0 : index
    %c0_2 = arith.constant 0 : index
    %0 = vector.load %arg2[%c0, %c0_0, %c0_1, %c0_2] : memref<1x10x18x4xf32, #tpu.memory_space<vmem>>, vector<1x10x18x4xf32>
    %1 = vector.shape_cast %0 : vector<1x10x18x4xf32> to vector<10x18x4xf32>
    %2 = arith.truncf %1 : vector<10x18x4xf32> to vector<10x18x4xbf16>
    %cst = arith.constant 0.000000e+00 : f32
    %3 = vector.broadcast %cst : f32 to vector<128x8xf32>
    %4 = vector.extract_strided_slice %2 {offsets = [0, 0, 0], sizes = [8, 16, 4], strides = [1, 1, 1]} : vector<10x18x4xbf16> to vector<8x16x4xbf16>
    %5 = vector.shape_cast %4 : vector<8x16x4xbf16> to vector<128x4xbf16>
    %c0_3 = arith.constant 0 : index
    %c0_4 = arith.constant 0 : index
    %c0_5 = arith.constant 0 : index
    %6 = vector.load %arg3[%c0_3, %c0_4, %c0_5] : memref<9x4x8xbf16, #tpu.memory_space<vmem>>, vector<1x4x8xbf16>
    %7 = vector.shape_cast %6 : vector<1x4x8xbf16> to vector<4x8xbf16>
    %cst_6 = arith.constant dense<0.000000e+00> : vector<128x8xf32>
    %8 = tpu.matmul %5, %7, %cst_6 {dimension_numbers = #tpu.dot_dimension_numbers<[1], [0], [0], [1], [0, 0, 1, 1], [], []>} : vector<128x4xbf16>, vector<4x8xbf16>, vector<128x8xf32> -> vector<128x8xf32>
    %9 = arith.addf %3, %8 : vector<128x8xf32>
    %10 = vector.extract_strided_slice %2 {offsets = [0, 1, 0], sizes = [8, 16, 4], strides = [1, 1, 1]} : vector<10x18x4xbf16> to vector<8x16x4xbf16>
    %11 = vector.shape_cast %10 : vector<8x16x4xbf16> to vector<128x4xbf16>
    %c1 = arith.constant 1 : index
    %c0_7 = arith.constant 0 : index
    %c0_8 = arith.constant 0 : index
    %12 = vector.load %arg3[%c1, %c0_7, %c0_8] : memref<9x4x8xbf16, #tpu.memory_space<vmem>>, vector<1x4x8xbf16>
    %13 = vector.shape_cast %12 : vector<1x4x8xbf16> to vector<4x8xbf16>
    %cst_9 = arith.constant dense<0.000000e+00> : vector<128x8xf32>
    %14 = tpu.matmul %11, %13, %cst_9 {dimension_numbers = #tpu.dot_dimension_numbers<[1], [0], [0], [1], [0, 0, 1, 1], [], []>} : vector<128x4xbf16>, vector<4x8xbf16>, vector<128x8xf32> -> vector<128x8xf32>
    %15 = arith.addf %9, %14 : vector<128x8xf32>
    %16 = vector.extract_strided_slice %2 {offsets = [0, 2, 0], sizes = [8, 16, 4], strides = [1, 1, 1]} : vector<10x18x4xbf16> to vector<8x16x4xbf16>
    %17 = vector.shape_cast %16 : vector<8x16x4xbf16> to vector<128x4xbf16>
    %c2 = arith.constant 2 : index
    %c0_10 = arith.constant 0 : index
    %c0_11 = arith.constant 0 : index
    %18 = vector.load %arg3[%c2, %c0_10, %c0_11] : memref<9x4x8xbf16, #tpu.memory_space<vmem>>, vector<1x4x8xbf16>
    %19 = vector.shape_cast %18 : vector<1x4x8xbf16> to vector<4x8xbf16>
    %cst_12 = arith.constant dense<0.000000e+00> : vector<128x8xf32>
    %20 = tpu.matmul %17, %19, %cst_12 {dimension_numbers = #tpu.dot_dimension_numbers<[1], [0], [0], [1], [0, 0, 1, 1], [], []>} : vector<128x4xbf16>, vector<4x8xbf16>, vector<128x8xf32> -> vector<128x8xf32>
    %21 = arith.addf %15, %20 : vector<128x8xf32>
    %22 = vector.extract_strided_slice %2 {offsets = [1, 0, 0], sizes = [8, 16, 4], strides = [1, 1, 1]} : vector<10x18x4xbf16> to vector<8x16x4xbf16>
    %23 = vector.shape_cast %22 : vector<8x16x4xbf16> to vector<128x4xbf16>
    %c3 = arith.constant 3 : index
    %c0_13 = arith.constant 0 : index
    %c0_14 = arith.constant 0 : index
    %24 = vector.load %arg3[%c3, %c0_13, %c0_14] : memref<9x4x8xbf16, #tpu.memory_space<vmem>>, vector<1x4x8xbf16>
    %25 = vector.shape_cast %24 : vector<1x4x8xbf16> to vector<4x8xbf16>
    %cst_15 = arith.constant dense<0.000000e+00> : vector<128x8xf32>
    %26 = tpu.matmul %23, %25, %cst_15 {dimension_numbers = #tpu.dot_dimension_numbers<[1], [0], [0], [1], [0, 0, 1, 1], [], []>} : vector<128x4xbf16>, vector<4x8xbf16>, vector<128x8xf32> -> vector<128x8xf32>
    %27 = arith.addf %21, %26 : vector<128x8xf32>
    %28 = vector.extract_strided_slice %2 {offsets = [1, 1, 0], sizes = [8, 16, 4], strides = [1, 1, 1]} : vector<10x18x4xbf16> to vector<8x16x4xbf16>
    %29 = vector.shape_cast %28 : vector<8x16x4xbf16> to vector<128x4xbf16>
    %c4 = arith.constant 4 : index
    %c0_16 = arith.constant 0 : index
    %c0_17 = arith.constant 0 : index
    %30 = vector.load %arg3[%c4, %c0_16, %c0_17] : memref<9x4x8xbf16, #tpu.memory_space<vmem>>, vector<1x4x8xbf16>
    %31 = vector.shape_cast %30 : vector<1x4x8xbf16> to vector<4x8xbf16>
    %cst_18 = arith.constant dense<0.000000e+00> : vector<128x8xf32>
    %32 = tpu.matmul %29, %31, %cst_18 {dimension_numbers = #tpu.dot_dimension_numbers<[1], [0], [0], [1], [0, 0, 1, 1], [], []>} : vector<128x4xbf16>, vector<4x8xbf16>, vector<128x8xf32> -> vector<128x8xf32>
    %33 = arith.addf %27, %32 : vector<128x8xf32>
    %34 = vector.extract_strided_slice %2 {offsets = [1, 2, 0], sizes = [8, 16, 4], strides = [1, 1, 1]} : vector<10x18x4xbf16> to vector<8x16x4xbf16>
    %35 = vector.shape_cast %34 : vector<8x16x4xbf16> to vector<128x4xbf16>
    %c5 = arith.constant 5 : index
    %c0_19 = arith.constant 0 : index
    %c0_20 = arith.constant 0 : index
    %36 = vector.load %arg3[%c5, %c0_19, %c0_20] : memref<9x4x8xbf16, #tpu.memory_space<vmem>>, vector<1x4x8xbf16>
    %37 = vector.shape_cast %36 : vector<1x4x8xbf16> to vector<4x8xbf16>
    %cst_21 = arith.constant dense<0.000000e+00> : vector<128x8xf32>
    %38 = tpu.matmul %35, %37, %cst_21 {dimension_numbers = #tpu.dot_dimension_numbers<[1], [0], [0], [1], [0, 0, 1, 1], [], []>} : vector<128x4xbf16>, vector<4x8xbf16>, vector<128x8xf32> -> vector<128x8xf32>
    %39 = arith.addf %33, %38 : vector<128x8xf32>
    %40 = vector.extract_strided_slice %2 {offsets = [2, 0, 0], sizes = [8, 16, 4], strides = [1, 1, 1]} : vector<10x18x4xbf16> to vector<8x16x4xbf16>
    %41 = vector.shape_cast %40 : vector<8x16x4xbf16> to vector<128x4xbf16>
    %c6 = arith.constant 6 : index
    %c0_22 = arith.constant 0 : index
    %c0_23 = arith.constant 0 : index
    %42 = vector.load %arg3[%c6, %c0_22, %c0_23] : memref<9x4x8xbf16, #tpu.memory_space<vmem>>, vector<1x4x8xbf16>
    %43 = vector.shape_cast %42 : vector<1x4x8xbf16> to vector<4x8xbf16>
    %cst_24 = arith.constant dense<0.000000e+00> : vector<128x8xf32>
    %44 = tpu.matmul %41, %43, %cst_24 {dimension_numbers = #tpu.dot_dimension_numbers<[1], [0], [0], [1], [0, 0, 1, 1], [], []>} : vector<128x4xbf16>, vector<4x8xbf16>, vector<128x8xf32> -> vector<128x8xf32>
    %45 = arith.addf %39, %44 : vector<128x8xf32>
    %46 = vector.extract_strided_slice %2 {offsets = [2, 1, 0], sizes = [8, 16, 4], strides = [1, 1, 1]} : vector<10x18x4xbf16> to vector<8x16x4xbf16>
    %47 = vector.shape_cast %46 : vector<8x16x4xbf16> to vector<128x4xbf16>
    %c7 = arith.constant 7 : index
    %c0_25 = arith.constant 0 : index
    %c0_26 = arith.constant 0 : index
    %48 = vector.load %arg3[%c7, %c0_25, %c0_26] : memref<9x4x8xbf16, #tpu.memory_space<vmem>>, vector<1x4x8xbf16>
    %49 = vector.shape_cast %48 : vector<1x4x8xbf16> to vector<4x8xbf16>
    %cst_27 = arith.constant dense<0.000000e+00> : vector<128x8xf32>
    %50 = tpu.matmul %47, %49, %cst_27 {dimension_numbers = #tpu.dot_dimension_numbers<[1], [0], [0], [1], [0, 0, 1, 1], [], []>} : vector<128x4xbf16>, vector<4x8xbf16>, vector<128x8xf32> -> vector<128x8xf32>
    %51 = arith.addf %45, %50 : vector<128x8xf32>
    %52 = vector.extract_strided_slice %2 {offsets = [2, 2, 0], sizes = [8, 16, 4], strides = [1, 1, 1]} : vector<10x18x4xbf16> to vector<8x16x4xbf16>
    %53 = vector.shape_cast %52 : vector<8x16x4xbf16> to vector<128x4xbf16>
    %c8 = arith.constant 8 : index
    %c0_28 = arith.constant 0 : index
    %c0_29 = arith.constant 0 : index
    %54 = vector.load %arg3[%c8, %c0_28, %c0_29] : memref<9x4x8xbf16, #tpu.memory_space<vmem>>, vector<1x4x8xbf16>
    %55 = vector.shape_cast %54 : vector<1x4x8xbf16> to vector<4x8xbf16>
    %cst_30 = arith.constant dense<0.000000e+00> : vector<128x8xf32>
    %56 = tpu.matmul %53, %55, %cst_30 {dimension_numbers = #tpu.dot_dimension_numbers<[1], [0], [0], [1], [0, 0, 1, 1], [], []>} : vector<128x4xbf16>, vector<4x8xbf16>, vector<128x8xf32> -> vector<128x8xf32>
    %57 = arith.addf %51, %56 : vector<128x8xf32>
    %c0_31 = arith.constant 0 : index
    %c0_32 = arith.constant 0 : index
    %58 = vector.load %arg4[%c0_31, %c0_32] : memref<1x8xf32, #tpu.memory_space<vmem>>, vector<1x8xf32>
    %59 = vector.shape_cast %58 : vector<1x8xf32> to vector<8xf32>
    %60 = vector.shape_cast %59 : vector<8xf32> to vector<1x8xf32>
    %61 = vector.broadcast %60 : vector<1x8xf32> to vector<128x8xf32>
    %62 = arith.addf %57, %61 : vector<128x8xf32>
    %c0_33 = arith.constant 0 : index
    %c0_34 = arith.constant 0 : index
    %c0_35 = arith.constant 0 : index
    %63 = vector.load %arg5[%c0_33, %c0_34, %c0_35] : memref<1x128x8xf32, #tpu.memory_space<vmem>>, vector<1x128x8xf32>
    %64 = vector.shape_cast %63 : vector<1x128x8xf32> to vector<128x8xf32>
    %65 = vector.shape_cast %62 : vector<128x8xf32> to vector<1x128x8xf32>
    tpu.vector_store %arg5[%c0_33, %c0_34, %c0_35], %65 {strides = array<i32>} : memref<1x128x8xf32, #tpu.memory_space<vmem>>, vector<1x128x8xf32>,
    %cst_36 = arith.constant dense<0.000000e+00> : vector<8xf32>
    %66 = vector.multi_reduction <add>, %62, %cst_36 [0] : vector<128x8xf32> to vector<8xf32>
    %67 = vector.shape_cast %66 : vector<8xf32> to vector<1x8xf32>
    %c0_37 = arith.constant 0 : index
    %c0_38 = arith.constant 0 : index
    %c0_39 = arith.constant 0 : index
    %68 = vector.load %arg6[%c0_37, %c0_38, %c0_39] : memref<1x1x8xf32, #tpu.memory_space<vmem>>, vector<1x1x8xf32>
    %69 = vector.shape_cast %68 : vector<1x1x8xf32> to vector<1x8xf32>
    %70 = vector.shape_cast %67 : vector<1x8xf32> to vector<1x1x8xf32>
    tpu.vector_store %arg6[%c0_37, %c0_38, %c0_39], %70 {strides = array<i32>} : memref<1x1x8xf32, #tpu.memory_space<vmem>>, vector<1x1x8xf32>,
    %71 = arith.mulf %62, %62 : vector<128x8xf32>
    %cst_40 = arith.constant dense<0.000000e+00> : vector<8xf32>
    %72 = vector.multi_reduction <add>, %71, %cst_40 [0] : vector<128x8xf32> to vector<8xf32>
    %73 = vector.shape_cast %72 : vector<8xf32> to vector<1x8xf32>
    %c0_41 = arith.constant 0 : index
    %c0_42 = arith.constant 0 : index
    %c0_43 = arith.constant 0 : index
    %74 = vector.load %arg7[%c0_41, %c0_42, %c0_43] : memref<1x1x8xf32, #tpu.memory_space<vmem>>, vector<1x1x8xf32>
    %75 = vector.shape_cast %74 : vector<1x1x8xf32> to vector<1x8xf32>
    %76 = vector.shape_cast %73 : vector<1x8xf32> to vector<1x1x8xf32>
    tpu.vector_store %arg7[%c0_41, %c0_42, %c0_43], %76 {strides = array<i32>} : memref<1x1x8xf32, #tpu.memory_space<vmem>>, vector<1x1x8xf32>,
    return
  }
  func.func @transform_0(%arg0: i32, %arg1: i32) -> (i32, i32, i32, i32) {
    %c2_i32 = arith.constant 2 : i32
    %0 = arith.muli %arg0, %c2_i32 : i32
    %1 = arith.addi %0, %arg1 : i32
    %c0_i32 = arith.constant 0 : i32
    %c0_i32_0 = arith.constant 0 : i32
    %c0_i32_1 = arith.constant 0 : i32
    %c0_i32_2 = arith.constant 0 : i32
    return %1, %c0_i32, %c0_i32_0, %c0_i32_1 : i32, i32, i32, i32
  }
  func.func @transform_1(%arg0: i32, %arg1: i32) -> (i32, i32, i32) {
    %c0_i32 = arith.constant 0 : i32
    %c0_i32_0 = arith.constant 0 : i32
    %c0_i32_1 = arith.constant 0 : i32
    %c0_i32_2 = arith.constant 0 : i32
    return %c0_i32, %c0_i32_0, %c0_i32_1 : i32, i32, i32
  }
  func.func @transform_2(%arg0: i32, %arg1: i32) -> (i32, i32) {
    %c0_i32 = arith.constant 0 : i32
    %c0_i32_0 = arith.constant 0 : i32
    %c0_i32_1 = arith.constant 0 : i32
    return %c0_i32, %c0_i32_0 : i32, i32
  }
  func.func @transform_3(%arg0: i32, %arg1: i32) -> (i32, i32, i32) {
    %c2_i32 = arith.constant 2 : i32
    %0 = arith.muli %arg0, %c2_i32 : i32
    %1 = arith.addi %0, %arg1 : i32
    %c0_i32 = arith.constant 0 : i32
    %c0_i32_0 = arith.constant 0 : i32
    %c0_i32_1 = arith.constant 0 : i32
    return %1, %c0_i32, %c0_i32_0 : i32, i32, i32
  }
  func.func @transform_4(%arg0: i32, %arg1: i32) -> (i32, i32, i32) {
    %c2_i32 = arith.constant 2 : i32
    %0 = arith.muli %arg0, %c2_i32 : i32
    %1 = arith.addi %0, %arg1 : i32
    %c0_i32 = arith.constant 0 : i32
    %c0_i32_0 = arith.constant 0 : i32
    %c0_i32_1 = arith.constant 0 : i32
    return %1, %c0_i32, %c0_i32_0 : i32, i32, i32
  }
  func.func @transform_5(%arg0: i32, %arg1: i32) -> (i32, i32, i32) {
    %c2_i32 = arith.constant 2 : i32
    %0 = arith.muli %arg0, %c2_i32 : i32
    %1 = arith.addi %0, %arg1 : i32
    %c0_i32 = arith.constant 0 : i32
    %c0_i32_0 = arith.constant 0 : i32
    %c0_i32_1 = arith.constant 0 : i32
    return %1, %c0_i32, %c0_i32_0 : i32, i32, i32
  }
}

module attributes {stable_mosaic.version = 11 : i64} {
  func.func @_bn_relu_kernel(%arg0: i32, %arg1: i32, %arg2: memref<1x8x128xf32, #tpu.memory_space<vmem>>, %arg3: memref<1x128xf32, #tpu.memory_space<vmem>>, %arg4: memref<1x128xf32, #tpu.memory_space<vmem>>, %arg5: memref<1x8x128xf32, #tpu.memory_space<vmem>>) attributes {dimension_semantics = [#tpu.dimension_semantics<parallel>, #tpu.dimension_semantics<parallel>], iteration_bounds = array<i64: 2, 2>, scalar_prefetch = 0 : i64, scratch_operands = 0 : i64, tpu.core_type = #tpu.core_type<tc>, window_params = [{transform_indices = @transform_0, window_bounds = array<i64: 1, 8, 128>}, {pipeline_mode = #tpu.pipeline_mode<synchronous>, transform_indices = @transform_1, window_bounds = array<i64: 1, 128>}, {pipeline_mode = #tpu.pipeline_mode<synchronous>, transform_indices = @transform_2, window_bounds = array<i64: 1, 128>}, {transform_indices = @transform_3, window_bounds = array<i64: 1, 8, 128>}]} {
    %c0 = arith.constant 0 : index
    %c0_0 = arith.constant 0 : index
    %c0_1 = arith.constant 0 : index
    %0 = vector.load %arg2[%c0, %c0_0, %c0_1] : memref<1x8x128xf32, #tpu.memory_space<vmem>>, vector<1x8x128xf32>
    %c0_2 = arith.constant 0 : index
    %c0_3 = arith.constant 0 : index
    %1 = vector.load %arg3[%c0_2, %c0_3] : memref<1x128xf32, #tpu.memory_space<vmem>>, vector<1x128xf32>
    %2 = vector.shape_cast %1 : vector<1x128xf32> to vector<128xf32>
    %3 = vector.shape_cast %2 : vector<128xf32> to vector<1x1x128xf32>
    %4 = vector.broadcast %3 : vector<1x1x128xf32> to vector<1x8x128xf32>
    %5 = arith.mulf %0, %4 : vector<1x8x128xf32>
    %c0_4 = arith.constant 0 : index
    %c0_5 = arith.constant 0 : index
    %6 = vector.load %arg4[%c0_4, %c0_5] : memref<1x128xf32, #tpu.memory_space<vmem>>, vector<1x128xf32>
    %7 = vector.shape_cast %6 : vector<1x128xf32> to vector<128xf32>
    %8 = vector.shape_cast %7 : vector<128xf32> to vector<1x1x128xf32>
    %9 = vector.broadcast %8 : vector<1x1x128xf32> to vector<1x8x128xf32>
    %10 = arith.addf %5, %9 : vector<1x8x128xf32>
    %cst = arith.constant 0.000000e+00 : f32
    %11 = vector.broadcast %cst : f32 to vector<1x8x128xf32>
    %12 = arith.maximumf %10, %11 : vector<1x8x128xf32>
    %c0_6 = arith.constant 0 : index
    %c0_7 = arith.constant 0 : index
    %c0_8 = arith.constant 0 : index
    %13 = vector.load %arg5[%c0_6, %c0_7, %c0_8] : memref<1x8x128xf32, #tpu.memory_space<vmem>>, vector<1x8x128xf32>
    tpu.vector_store %arg5[%c0_6, %c0_7, %c0_8], %12 {strides = array<i32>} : memref<1x8x128xf32, #tpu.memory_space<vmem>>, vector<1x8x128xf32>,
    return
  }
  func.func @transform_0(%arg0: i32, %arg1: i32) -> (i32, i32, i32) {
    %c0_i32 = arith.constant 0 : i32
    %c0_i32_0 = arith.constant 0 : i32
    return %arg0, %arg1, %c0_i32 : i32, i32, i32
  }
  func.func @transform_1(%arg0: i32, %arg1: i32) -> (i32, i32) {
    %c0_i32 = arith.constant 0 : i32
    %c0_i32_0 = arith.constant 0 : i32
    %c0_i32_1 = arith.constant 0 : i32
    return %c0_i32, %c0_i32_0 : i32, i32
  }
  func.func @transform_2(%arg0: i32, %arg1: i32) -> (i32, i32) {
    %c0_i32 = arith.constant 0 : i32
    %c0_i32_0 = arith.constant 0 : i32
    %c0_i32_1 = arith.constant 0 : i32
    return %c0_i32, %c0_i32_0 : i32, i32
  }
  func.func @transform_3(%arg0: i32, %arg1: i32) -> (i32, i32, i32) {
    %c0_i32 = arith.constant 0 : i32
    %c0_i32_0 = arith.constant 0 : i32
    return %arg0, %arg1, %c0_i32 : i32, i32, i32
  }
}

</mosaic_0001>

<bundles_post_ra>
// kernel: mul.11
= control target key start
LH: loop header
LB: loop body
LE: loop exit
PB: predicated region body
PF: predicated region fallthrough
CT: control target
= control target key end

     0   :  { %vm22_vm0 = vcmask 23552   ;;  %s52_s14 = smov 3   ;;  %vm28_vm1 = vcmask 72752   ;;  %vm34_vm2 = vcmask 48152   ;;  %s78_s0 = inlined_call_operand.vmem [shape: f32[3,3,4], index: 0, kind: input, shape index: {}]   ;;  %s79_s1 = inlined_call_operand.vmem [shape: f32[9,4], index: 1, kind: output, shape index: {}]  }
   0x1   :  { %v46_v0 = vld [vmem:[%s78_s0 + $0xc] sm:$0xf]  ;;  %v47_v1 = vld [vmem:[%s78_s0 + $0x8] sm:$0xf]  ;;  %v48_v2 = vld [vmem:[%s78_s0 + $0x4] sm:$0xf] }
   0x2   :  { %9 = vst [vmem:[#allocation1 + $0x18] sm:$0xf] %v46_v0  ;;  %14 = vst [vmem:[#allocation1 + $0x10] sm:$0xf] %v47_v1  ;;  %v19_v3 = vld [vmem:[%s78_s0] sm:$0xf] }
   0x3   :  { %18 = vst [vmem:[#allocation1 + $0x8] sm:$0xf] %v48_v2  ;;  %20 = vst [vmem:[#allocation1] sm:$0xf] %v19_v3  ;;  %s51_s0 = smov 6  }
   0xa   :  { %v25_v4 = vld [vmem:[#allocation1 + $0x2] ss:$8 sm:$0xf]   ;;  %v21_v5 = vld [vmem:[#allocation1] ss:$8 sm:$0xf]  }
   0xb   :  { %26 = vrot.lane.b32.xlu0 %v25_v4, %s51_s0  ;;  %v31_v6 = vld [vmem:[#allocation1 + $0x1] ss:$8 sm:$0xf]   ;;  %23 = vst.msk [vmem:[#allocation0] sm:$0xf] %vm22_vm0, %v21_v5  }
   0xf   :  { %32 = vrot.lane.b32.xlu0 %v31_v6, %s52_s14 }
  0x7d   :  { %v27_v7 = vpop.permute.xlu0 %26  }
  0x7e   :  { %29 = vst.msk [vmem:[#allocation0] sm:$0xf] %vm28_vm1, %v27_v7  }
  0x81   :  { %v33_v8 = vpop.permute.xlu0 %32  }
  0x82   :  { %35 = vst.msk [vmem:[#allocation0] sm:$0xf] %vm34_vm2, %v33_v8  }
  0x89   :  { %v40_v9 = vld [vmem:[#allocation0] sm:$0xf] }
  0x8a   :  { %43 = vst [vmem:[%s79_s1] sm:$0xf] %v40_v9 }

// kernel: tile.18
= control target key start
LH: loop header
LB: loop body
LE: loop exit
PB: predicated region body
PF: predicated region fallthrough
CT: control target
= control target key end

     0   :  { %s28_s0 = inlined_call_operand.vmem [shape: f32[8], index: 0, kind: input, shape index: {}]   ;;  %s29_s1 = inlined_call_operand.vmem [shape: f32[16,8], index: 1, kind: output, shape index: {}]  }
   0x1   :  { %v4_v0 = vld [vmem:[%s28_s0] ss:$0 sm:$0xff] }
   0x2   :  { %5 = vst [vmem:[%s29_s1] sm:$0xff] %v4_v0  ;;  %8 = vst [vmem:[%s29_s1 + $0x8] sm:$0xff] %v4_v0 }

// kernel: tile.19
= control target key start
LH: loop header
LB: loop body
LE: loop exit
PB: predicated region body
PF: predicated region fallthrough
CT: control target
= control target key end

     0   :  { %s133_s10 = smov 120   ;;  %s134_s11 = smov 104   ;;  %vm3_vm0 = vcmask 64512   ;;  %vm9_vm1 = vcmask 1048512   ;;  %vm15_vm2 = vcmask 982912   ;;  %vm21_vm3 = vcmask 917312   ;;  %s209_s0 = inlined_call_operand.vmem [shape: f32[16,8], index: 0, kind: input, shape index: {}]   ;;  %s210_s1 = inlined_call_operand.vmem [shape: f32[1,128], index: 1, kind: output, shape index: {}]  }
   0x1   :  { %v103_v0 = vld [vmem:[%s209_s0 + $0xf] sm:$0x1]   ;;  %v105_v1 = vld [vmem:[%s209_s0 + $0xd] sm:$0x1]   ;;  %v104_v2 = vld [vmem:[%s209_s0 + $0xe] sm:$0x1]  }
   0x2   :  { %7 = vrot.lane.b32.xlu0 %v103_v0, %s133_s10  ;;  %19 = vrot.lane.b32.xlu1 %v105_v1, %s134_s11  ;;  %v106_v3 = vld [vmem:[%s209_s0 + $0xc] sm:$0x1]   ;;  %s135_s16 = smov 112   ;;  %s136_s17 = smov 96   ;;  %v107_v4 = vld [vmem:[%s209_s0 + $0xb] sm:$0x1]  }
   0x3   :  { %v108_v5 = vld [vmem:[%s209_s0 + $0xa] sm:$0x1]   ;;  %v2_v6 = vld [vmem:[%s209_s0] sm:$0x1]   ;;  %s137_s24 = smov 88   ;;  %s138_s25 = smov 80  }
   0x4   :  { %4 = vst.msk [vmem:[#allocation0] sm:$0x1] %vm3_vm0, %v2_v6   ;;  %v109_v7 = vld [vmem:[%s209_s0 + $0x9] sm:$0x1]   ;;  %v110_v8 = vld [vmem:[%s209_s0 + $0x8] sm:$0x1]  }
   0x5   :  { %s139_s30 = smov 72   ;;  %s140_s2 = smov 64   ;;  %v111_v9 = vld [vmem:[%s209_s0 + $0x7] sm:$0x1]   ;;  %v112_v10 = vld [vmem:[%s209_s0 + $0x6] sm:$0x1]  }
   0x6   :  { %13 = vrot.lane.b32.xlu0 %v104_v2, %s135_s16  ;;  %25 = vrot.lane.b32.xlu1 %v106_v3, %s136_s17  ;;  %s141_s7 = smov 56   ;;  %s142_s8 = smov 48   ;;  %v113_v11 = vld [vmem:[%s209_s0 + $0x5] sm:$0x1]   ;;  %v114_v12 = vld [vmem:[%s209_s0 + $0x4] sm:$0x1]  }
   0x7   :  { %s143_s13 = smov 40   ;;  %s144_s14 = smov 32   ;;  %v115_v13 = vld [vmem:[%s209_s0 + $0x3] sm:$0x1]   ;;  %v116_v14 = vld [vmem:[%s209_s0 + $0x2] sm:$0x1]  }
   0x8   :  { %s145_s19 = smov 24   ;;  %s146_s20 = smov 16   ;;  %v117_v15 = vld [vmem:[%s209_s0 + $0x1] sm:$0x1]   ;;  %vm27_vm4 = vcmask 851712   ;;  %vm33_vm5 = vcmask 786112  }
   0x9   :  { %s147_s0 = smov 8   ;;  %vm39_vm6 = vcmask 720512   ;;  %vm45_vm7 = vcmask 654912   ;;  %vm51_vm8 = vcmask 589312   ;;  %vm57_vm9 = vcmask 523712  }
   0xa   :  { %31 = vrot.lane.b32.xlu0 %v107_v4, %s137_s24  ;;  %37 = vrot.lane.b32.xlu1 %v108_v5, %s138_s25  ;;  %vm63_vm10 = vcmask 458112   ;;  %vm69_vm11 = vcmask 392512   ;;  %vm75_vm12 = vcmask 326912   ;;  %vm81_vm13 = vcmask 261312  }
   0xb   :  { %vm87_vm14 = vcmask 195712   ;;  %vm93_vm15 = vcmask 130112  }
   0xe   :  { %43 = vrot.lane.b32.xlu0 %v109_v7, %s139_s30  ;;  %49 = vrot.lane.b32.xlu1 %v110_v8, %s140_s2 }
  0x12   :  { %55 = vrot.lane.b32.xlu0 %v111_v9, %s141_s7  ;;  %61 = vrot.lane.b32.xlu1 %v112_v10, %s142_s8 }
  0x16   :  { %67 = vrot.lane.b32.xlu0 %v113_v11, %s143_s13  ;;  %73 = vrot.lane.b32.xlu1 %v114_v12, %s144_s14 }
  0x1a   :  { %79 = vrot.lane.b32.xlu0 %v115_v13, %s145_s19  ;;  %85 = vrot.lane.b32.xlu1 %v116_v14, %s146_s20 }
  0x1e   :  { %91 = vrot.lane.b32.xlu0 %v117_v15, %s147_s0 }
  0x74   :  { %v8_v16 = vpop.permute.xlu0 %7   ;;  %v20_v17 = vpop.permute.xlu1 %19  }
  0x75   :  { %10 = vst.msk [vmem:[#allocation0] sm:$0x1] %vm9_vm1, %v8_v16  }
  0x78   :  { %v14_v18 = vpop.permute.xlu0 %13   ;;  %v26_v19 = vpop.permute.xlu1 %25  }
  0x79   :  { %16 = vst.msk [vmem:[#allocation0] sm:$0x1] %vm15_vm2, %v14_v18  }
  0x7a   :  { %22 = vst.msk [vmem:[#allocation0] sm:$0x1] %vm21_vm3, %v20_v17  }
  0x7b   :  { %28 = vst.msk [vmem:[#allocation0] sm:$0x1] %vm27_vm4, %v26_v19  }
  0x7c   :  { %v32_v20 = vpop.permute.xlu0 %31   ;;  %v38_v21 = vpop.permute.xlu1 %37  }
  0x7d   :  { %34 = vst.msk [vmem:[#allocation0] sm:$0x1] %vm33_vm5, %v32_v20  }
  0x7e   :  { %40 = vst.msk [vmem:[#allocation0] sm:$0x1] %vm39_vm6, %v38_v21  }
  0x80   :  { %v44_v22 = vpop.permute.xlu0 %43   ;;  %v50_v23 = vpop.permute.xlu1 %49  }
  0x81   :  { %46 = vst.msk [vmem:[#allocation0] sm:$0x1] %vm45_vm7, %v44_v22  }
  0x82   :  { %52 = vst.msk [vmem:[#allocation0] sm:$0x1] %vm51_vm8, %v50_v23  }
  0x84   :  { %v56_v24 = vpop.permute.xlu0 %55   ;;  %v62_v25 = vpop.permute.xlu1 %61  }
  0x85   :  { %58 = vst.msk [vmem:[#allocation0] sm:$0x1] %vm57_vm9, %v56_v24  }
  0x86   :  { %64 = vst.msk [vmem:[#allocation0] sm:$0x1] %vm63_vm10, %v62_v25  }
  0x88   :  { %v68_v26 = vpop.permute.xlu0 %67   ;;  %v74_v27 = vpop.permute.xlu1 %73  }
  0x89   :  { %70 = vst.msk [vmem:[#allocation0] sm:$0x1] %vm69_vm11, %v68_v26  }
  0x8a   :  { %76 = vst.msk [vmem:[#allocation0] sm:$0x1] %vm75_vm12, %v74_v27  }
  0x8c   :  { %v80_v28 = vpop.permute.xlu0 %79   ;;  %v86_v29 = vpop.permute.xlu1 %85  }
  0x8d   :  { %82 = vst.msk [vmem:[#allocation0] sm:$0x1] %vm81_vm13, %v80_v28  }
  0x8e   :  { %88 = vst.msk [vmem:[#allocation0] sm:$0x1] %vm87_vm14, %v86_v29  }
  0x90   :  { %v92_v30 = vpop.permute.xlu0 %91  }
  0x91   :  { %94 = vst.msk [vmem:[#allocation0] sm:$0x1] %vm93_vm15, %v92_v30  }
  0x98   :  { %v99_v31 = vld [vmem:[#allocation0] sm:$0x1] }
  0x99   :  { %102 = vst [vmem:[%s210_s1] sm:$0x1] %v99_v31 }

// kernel: depthwise_separable_conv.3
= control target key start
LH: loop header
LB: loop body
LE: loop exit
PB: predicated region body
PF: predicated region fallthrough
CT: control target
= control target key end

     0   :  { %s420_s12 = smov 0   ;;  %s422_s13 = smov 0   ;;  %s471_s0 = inlined_call_operand.vmem [shape: f32[2,16,128], index: 0, kind: input, shape index: {}, may-alias: {0,3}]   ;;  %s472_s1 = inlined_call_operand.vmem [shape: f32[1,128], index: 1, kind: input, shape index: {}]   ;;  %s473_s2 = inlined_call_operand.vmem [shape: f32[1,128], index: 2, kind: input, shape index: {}]   ;;  %s474_s3 = inlined_call_operand.vmem [shape: f32[2,16,128], index: 3, kind: output, shape index: {}, may-alias: {0,3}]  }
   0x1   :  { %s424_s14 = smov 0   ;;  %s426_s15 = smov 0  }
   0x2   :  { %s428_s16 = smov 0  }
   0x3 LB: > { %s22_s17 = sadd.s32 1, %s390_s14  ;;  %s25_s18 = sadd.s32 1, %s394_s15  ;;  %s398_s16 = sphi %s428_s16, %s13_s16   ;;  %s394_s15 = sphi %s426_s15, %s478_s15   ;;  %s390_s14 = sphi %s424_s14, %s477_s14   ;;  %s386_s13 = sphi %s422_s13, %s476_s13   ;;  %s382_s12 = sphi %s420_s12, %s475_s12  }
   0x4   : > { %p23_p0 = scmp.ge.s32.totalorder %s22_s17, 2  ;;  %p311_p1 = scmp.ge.s32.totalorder %s398_s16, 1 }
   0x5   : > { %p156_p2 = scmp.lt.s32.totalorder %s398_s16, 5 }
   0x6   : > { %s480_s17 = smov (%p23_p0, %s22_s17), 0  ;;  %s482_s18 = smov (!%p23_p0, %s25_s18), %s394_s15 }
   0x7   : > { %p157_p3 = pnand %p311_p1, %p156_p2  ;;  %p27_p4 = scmp.ge.s32.totalorder %s482_s18, 2 }
   0x8   : > { %p186_p5 = scmp.lt.s32.totalorder (!%p157_p3), %s386_s13, 1  ;;  %p188_p6 = scmp.lt.s32.totalorder (!%p157_p3), %s382_s12, 1 }
   0x9   : > { %s484_s18 = smov (%p27_p4, %s482_s18), 0  ;;  %160 = sbr.rel (%p157_p3) target bundleno = 27 (0x1b), region = 32 }
   0xe   : > { %s486_s13 = smov (!%p186_p5, %s386_s13), 1  ;;  %s488_s12 = smov (!%p188_p6, %s382_s12), 1  ;;  %v316_v0 = vld [vmem:[%s472_s1] ss:$0 sm:$0xff] }
   0xf   : > { %s312_s19 = sshll.u32 %s486_s13, 1  ;;  %v317_v2 = vld [vmem:[%s473_s2] ss:$0 sm:$0xff] }
  0x10   : > { %s191_s20 = sadd.s32 %s312_s19, %s488_s12 }
  0x11   : > { %s313_s21 = sshll.u32 %s191_s20, 3 }
  0x12   : > { %s193_s26 = scalar_lea.vmem %s471_s0, %s313_s21  ;;  %s201_s4 = scalar_lea.vmem %s474_s3, %s313_s21 }
  0x13   : > { %v202_v1 = vld [vmem:[%s193_s26] sm:$0xff] }
  0x14   : > { %v210_v3 = vmul.f32 %v316_v0, %v202_v1 }
  0x16   : > { %v218_v4 = vadd.f32 %v317_v2, %v210_v3 }
  0x18   : > { %v219_v5 = vmax.f32 %v218_v4, 0.0 }
  0x1a   : > { %220 = vst [vmem:[%s201_s4] sm:$0xff] %v219_v5 }
  0x1b PF: > { %s13_s16 = sadd.s32 1, %s398_s16   ;;  %s475_s12 = smov %s390_s14 }
  0x1c   : > { %p10_p7 = scmp.ge.s32.totalorder %s13_s16, 6   ;;  %s476_s13 = smov %s394_s15 }
  0x1d   : > { %s477_s14 = smov %s480_s17  ;;  %s478_s15 = smov %s484_s18 }
  0x1e   :  { %12 = sbr.rel (!%p10_p7) target bundleno = 3 (0x3), region = 62 }

// kernel: depthwise_separable_conv.2
= control target key start
LH: loop header
LB: loop body
LE: loop exit
PB: predicated region body
PF: predicated region fallthrough
CT: control target
= control target key end

     0   :  { %s2370_s18 = smov 0   ;;  %s2372_s19 = smov 0   ;;  %s3065_s0 = inlined_call_operand.vmem [shape: f32[4,10,18,4], index: 0, kind: input, shape index: {}]   ;;  %s3066_s1 = inlined_call_operand.vmem [shape: bf16[9,4,8], index: 1, kind: input, shape index: {}]   ;;  %s3067_s2 = inlined_call_operand.vmem [shape: f32[1,8], index: 2, kind: input, shape index: {}]   ;;  %s3068_s3 = inlined_call_operand.vmem [shape: f32[4,128,8], index: 3, kind: output, shape index: {0}]   ;;  %s3069_s4 = inlined_call_operand.vmem [shape: f32[4,1,8], index: 4, kind: output, shape index: {1}]   ;;  %s3070_s5 = inlined_call_operand.vmem [shape: f32[4,1,8], index: 5, kind: output, shape index: {2}]  }
   0x1   :  { %s2374_s20 = smov 0   ;;  %s2376_s21 = smov 0  }
   0x2   :  { %s2378_s22 = smov 0  }
   0x3 LB: > { %s25_s23 = sadd.s32 1, %s2330_s20  ;;  %s28_s24 = sadd.s32 1, %s2334_s21  ;;  %s2338_s22 = sphi %s2378_s22, %s16_s22   ;;  %s2334_s21 = sphi %s2376_s21, %s3112_s21   ;;  %s2330_s20 = sphi %s2374_s20, %s3111_s20   ;;  %s2326_s19 = sphi %s2372_s19, %s3110_s19   ;;  %s2322_s18 = sphi %s2370_s18, %s3109_s18  }
   0x4   : > { %p26_p0 = scmp.ge.s32.totalorder %s25_s23, 2  ;;  %p1912_p1 = scmp.ge.s32.totalorder %s2338_s22, 1 }
   0x5   : > { %p224_p2 = scmp.lt.s32.totalorder %s2338_s22, 5 }
   0x6   : > { %s3114_s23 = smov (%p26_p0, %s25_s23), 0  ;;  %s3116_s24 = smov (!%p26_p0, %s28_s24), %s2334_s21 }
   0x7   : > { %p225_p3 = pnand %p1912_p1, %p224_p2  ;;  %p30_p4 = scmp.ge.s32.totalorder %s3116_s24, 2 }
   0x9   : > { %s3118_s24 = smov (%p30_p4, %s3116_s24), 0  ;;  %228 = sbr.rel (%p225_p3) target bundleno = 401 (0x191), region = 32 }
   0xe   : > { %v1920_v0 = vld [vmem:[%s3066_s1 + $0x2] sm:$0x3]  ;;  %vm474_vm0 = vcmask 1041408   ;;  %s1913_s27 = sshll.u32 %s2326_s19, 1  ;;  %v349_v2 = vld [vmem:[%s3066_s1] sm:$0x3] }
   0xf   : > { %2250 = vmatprep.subr.msk.bf16.mxu1 %vm474_vm0, %v1920_v0  ;;  %2249 = vmatprep.subr.msk.bf16.mxu0 %vm474_vm0, %v1920_v0  ;;  %v476_v1 = vsel %vm474_vm0, %v1920_v0, 0  ;;  %s267_s28 = sadd.s32 %s2322_s18, %s1913_s27  ;;  %v1937_v3 = vld [vmem:[%s3066_s1 + $0x4] sm:$0x3]  ;;  %vm350_vm1 = vsmask.f32 7424  ;;  %vm449_vm2 = vcmask 31744  }
  0x10   : > { %2248 = vmatpush3.bf16.msra.mxu1 %v476_v1  ;;  %2086 = vmatpush3.bf16.msra.mxu0 %v476_v1  ;;  %p268_p5 = scmp.lt.s32.totalorder %s267_s28, 3  ;;  %v2440_v17 = vsel %vm474_vm0, %v349_v2, 0  ;;  %v759_v39 = vsel %vm474_vm0, %v1937_v3, 0  ;;  %vm707_vm3 = vcmask 1046528   ;;  %vm1655_vm4 = vcmask 64512  }
  0x11   : > { %2251 = vmatprep.subr.msk.bf16.mxu1 %vm474_vm0, %v349_v2  ;;  %2252 = vmatprep.subr.msk.bf16.mxu0 %vm474_vm0, %v1937_v3  ;;  %v2497_v2 = vld [vmem:[%s3066_s1 + $0x8] sm:$0x3]  ;;  %vm1709_vm5 = vcmask 57344  }
  0x12   : > { %s3120_s28 = smov (!%p268_p5, %s267_s28), 3 }
  0x13   : > { %s2259_s8 = smul.u32 240, %s3120_s28  ;;  %s2003_s30 = sshll.u32 %s3120_s28, 7 }
  0x14   : > { %s2926_s10 = scalar_lea.vmem %s3068_s3, %s2003_s30  ;;  %s288_s13 = scalar_lea.vmem %s3069_s4, %s3120_s28 }
  0x15   : > { %s2420_s11 = scalar_lea.vmem %s3065_s0, %s2259_s8  ;;  %s295_s16 = scalar_lea.vmem %s3070_s5, %s3120_s28 }
  0x16   : > { %v299_v4 = vld [vmem:[%s2420_s11] sm:$0xff]  ;;  %v300_v5 = vld [vmem:[%s2420_s11 + $0x8] sm:$0xff]  ;;  %v301_v6 = vld [vmem:[%s2420_s11 + $0x10] sm:$0x3] }
  0x17   : > { %v2425_v7 = vpack.c.bf16 %v300_v5, %v299_v4  ;;  %v2427_v8 = vpack.c.bf16 %v301_v6, %v301_v6  ;;  %v311_v9 = vld [vmem:[%s2420_s11 + $0x60] sm:$0xff]  ;;  %v312_v10 = vld [vmem:[%s2420_s11 + $0x68] sm:$0xff]  ;;  %v313_v11 = vld [vmem:[%s2420_s11 + $0x70] sm:$0x3] }
  0x18   : > { %v2432_v12 = vpack.c.bf16 %v312_v10, %v311_v9  ;;  %v2434_v13 = vpack.c.bf16 %v313_v11, %v313_v11  ;;  %v302_v14 = vld [vmem:[%s2420_s11 + $0x18] sm:$0xff]  ;;  %v303_v15 = vld [vmem:[%s2420_s11 + $0x20] sm:$0xff]  ;;  %v304_v16 = vld [vmem:[%s2420_s11 + $0x28] sm:$0x3] }
  0x19   : > { %v352_v18 = vshrl.u32 %v2425_v7, 16  ;;  %v354_v19 = vshll.u32 %v2425_v7, 16  ;;  %v359_v20 = vshll.u32 %v2427_v8, 16  ;;  %v2445_v21 = vpack.c.bf16 %v303_v15, %v302_v14  ;;  %v314_v22 = vld [vmem:[%s2420_s11 + $0x78] sm:$0xff]  ;;  %v315_v23 = vld [vmem:[%s2420_s11 + $0x80] sm:$0xff]  ;;  %v305_v24 = vld [vmem:[%s2420_s11 + $0x30] sm:$0xff] }
  0x1a   : > { %v400_v25 = vshrl.u32 %v2432_v12, 16  ;;  %v402_v26 = vshll.u32 %v2432_v12, 16  ;;  %v407_v27 = vshll.u32 %v2434_v13, 16  ;;  %v2453_v28 = vpack.c.bf16 %v304_v16, %v304_v16  ;;  %v316_v29 = vld [vmem:[%s2420_s11 + $0x88] sm:$0x3]  ;;  %v306_v30 = vld [vmem:[%s2420_s11 + $0x38] sm:$0xff] }
  0x1b   : > { %v356_v31 = vrot.slane %v354_v19, 1  ;;  %v361_v32 = vrot.slane %v359_v20, 1  ;;  %v364_v33 = vshrl.u32 %v2445_v21, 16  ;;  %v366_v34 = vshll.u32 %v2445_v21, 16  ;;  %v307_v35 = vld [vmem:[%s2420_s11 + $0x40] sm:$0x3] }
  0x1c   : > { %v404_v36 = vrot.slane %v402_v26, 1  ;;  %v409_v37 = vrot.slane %v407_v27, 1  ;;  %v371_v38 = vshll.u32 %v2453_v28, 16  ;;  %v2462_v42 = vpack.c.bf16 %v315_v23, %v314_v22  ;;  %v317_v48 = vld [vmem:[%s2420_s11 + $0x90] sm:$0xff]  ;;  %v318_v49 = vld [vmem:[%s2420_s11 + $0x98] sm:$0xff]  ;;  %v308_v55 = vld [vmem:[%s2420_s11 + $0x48] sm:$0xff] }
  0x1d   : > { %v357_v40 = vor.u32 %v356_v31, %v352_v18  ;;  %v368_v41 = vrot.slane %v366_v34, 1  ;;  %v2464_v43 = vpack.c.bf16 %v316_v29, %v316_v29  ;;  %v2466_v46 = vpack.c.bf16 %v306_v30, %v305_v24  ;;  %v319_v54 = vld [vmem:[%s2420_s11 + $0xa0] sm:$0x3]  ;;  %v309_v56 = vld [vmem:[%s2420_s11 + $0x50] sm:$0xff]  ;;  %v310_v1 = vld [vmem:[%s2420_s11 + $0x58] sm:$0x3] }
  0x1e   : > { %v405_v44 = vor.u32 %v404_v36, %v400_v25  ;;  %v373_v45 = vrot.slane %v371_v38, 1  ;;  %v2468_v47 = vpack.c.bf16 %v307_v35, %v307_v35  ;;  %v412_v52 = vshrl.u32 %v2462_v42, 16  ;;  %v320_v9 = vld [vmem:[%s2420_s11 + $0xa8] sm:$0xff]  ;;  %v321_v10 = vld [vmem:[%s2420_s11 + $0xb0] sm:$0xff]  ;;  %v322_v18 = vld [vmem:[%s2420_s11 + $0xb8] sm:$0x3] }
  0x1f   : > { %v362_v50 = vsel %vm350_vm1, %v357_v40, %v361_v32  ;;  %v369_v51 = vor.u32 %v368_v41, %v364_v33  ;;  %v414_v53 = vshll.u32 %v2462_v42, 16  ;;  %v419_v58 = vshll.u32 %v2464_v43, 16  ;;  %v1946_v29 = vld [vmem:[%s3066_s1 + $0x6] sm:$0x3] }
  0x20   : > { %2087 = vmatprep.mubr.msk.bf16.mxu0 %vm449_vm2, %v362_v50  ;;  %v2480_v57 = vsel %vm350_vm1, %v405_v44, %v409_v37  ;;  %v376_v59 = vshrl.u32 %v2466_v46, 16  ;;  %v378_v60 = vshll.u32 %v2466_v46, 16  ;;  %v383_v63 = vshll.u32 %v2468_v47, 16 }
  0x21   : > { %2095 = vmatprep.mubr.msk.bf16.mxu1 %vm449_vm2, %v2480_v57  ;;  %v2488_v61 = vsel %vm350_vm1, %v369_v51, %v373_v45  ;;  %v416_v62 = vrot.slane %v414_v53, 1  ;;  %v2491_v0 = vpack.c.bf16 %v318_v49, %v317_v48  ;;  %v421_v3 = vrot.slane %v419_v58, 1  ;;  %v323_v53 = vld [vmem:[%s2420_s11 + $0xc0] sm:$0xff] }
  0x22   : > { %2088 = vmatmul.mubr.msk.bf16.vlgmr.msra.gmra.mxu0 %vm449_vm2, %v2488_v61  ;;  %v380_v4 = vrot.slane %v378_v60, 1  ;;  %v2501_v5 = vpack.c.bf16 %v319_v54, %v319_v54  ;;  %v2503_v6 = vpack.c.bf16 %v309_v56, %v308_v55  ;;  %v385_v14 = vrot.slane %v383_v63, 1  ;;  %v324_v54 = vld [vmem:[%s2420_s11 + $0xc8] sm:$0xff]  ;;  %v325_v55 = vld [vmem:[%s2420_s11 + $0xd0] sm:$0x3]  ;;  %v326_v60 = vld [vmem:[%s2420_s11 + $0xd8] sm:$0xff] }
  0x23   : > { %v417_v11 = vor.u32 %v416_v62, %v412_v52  ;;  %2122 = vmatpush3.bf16.msra.mxu0 %v759_v39  ;;  %v424_v15 = vshrl.u32 %v2491_v0, 16  ;;  %v426_v16 = vshll.u32 %v2491_v0, 16  ;;  %v2511_v22 = vpack.c.bf16 %v310_v1, %v310_v1  ;;  %v327_v62 = vld [vmem:[%s2420_s11 + $0xe0] sm:$0xff] }
  0x24   : > { %v381_v19 = vor.u32 %v380_v4, %v376_v59  ;;  %v431_v20 = vshll.u32 %v2501_v5, 16  ;;  %v388_v23 = vshrl.u32 %v2503_v6, 16  ;;  %2254 = vmatprep.subr.msk.bf16.mxu0 %vm474_vm0, %v2497_v2  ;;  %v390_v26 = vshll.u32 %v2503_v6, 16 }
  0x25   : > { %v2517_v24 = vsel %vm350_vm1, %v417_v11, %v421_v3  ;;  %v428_v25 = vrot.slane %v426_v16, 1  ;;  %v2520_v27 = vpack.c.bf16 %v321_v10, %v320_v9  ;;  %v395_v32 = vshll.u32 %v2511_v22, 16 }
  0x26   : > { %2096 = vmatmul.mubr.msk.bf16.vlgmr.msra.gmra.mxu1 %vm449_vm2, %v2517_v24  ;;  %v2528_v30 = vsel %vm350_vm1, %v381_v19, %v385_v14  ;;  %v433_v31 = vrot.slane %v431_v20, 1  ;;  %v2531_v33 = vpack.c.bf16 %v322_v18, %v322_v18  ;;  %v392_v35 = vrot.slane %v390_v26, 1 }
  0x27   : > { %2104 = vmatpush3.bf16.msra.mxu1 %v2440_v17  ;;  %2091 = vmatprep.mubr.msk.bf16.mxu0 %vm449_vm2, %v2528_v30  ;;  %v429_v34 = vor.u32 %v428_v25, %v424_v15  ;;  %v436_v36 = vshrl.u32 %v2520_v27, 16  ;;  %v438_v37 = vshll.u32 %v2520_v27, 16  ;;  %v397_v38 = vrot.slane %v395_v32, 1 }
  0x28   : > { %v443_v39 = vshll.u32 %v2531_v33, 16  ;;  %v708_v40 = vrot.slane %v2425_v7, 1  ;;  %v709_v41 = vrot.slane %v2427_v8, 1  ;;  %2253 = vmatprep.subr.msk.bf16.mxu1 %vm474_vm0, %v1946_v29  ;;  %v393_v44 = vor.u32 %v392_v35, %v388_v23 }
  0x29   : > { %v2543_v17 = vsel %vm350_vm1, %v429_v34, %v433_v31  ;;  %v440_v45 = vrot.slane %v438_v37, 1  ;;  %v712_v51 = vrot.slane %v2453_v28, 1  ;;  %v711_v52 = vrot.slane %v2445_v21, 1  ;;  %v328_v28 = vld [vmem:[%s2420_s11 + $0xe8] sm:$0x3] }
  0x2a   : > { %2099 = vmatprep.mubr.msk.bf16.mxu1 %vm449_vm2, %v2543_v17  ;;  %v445_v48 = vrot.slane %v443_v39, 1  ;;  %v710_v49 = vsel %vm707_vm3, %v708_v40, %v709_v41  ;;  %v2549_v50 = vsel %vm350_vm1, %v393_v44, %v397_v38  ;;  %v714_v58 = vrot.slane %v2466_v46, 1  ;;  %v1964_v38 = vld [vmem:[%s3066_s1 + $0xa] sm:$0x3] }
  0x2b   : > { %v441_v8 = vor.u32 %v440_v45, %v436_v36  ;;  %2092 = vmatmul.mubr.msk.bf16.gmra.mxu0 %vm449_vm2, %v2549_v50  ;;  %v715_v59 = vrot.slane %v2468_v47, 1  ;;  %v2571_v63 = vpack.c.bf16 %v324_v54, %v323_v53  ;;  %v346_v1 = vpack.c.bf16 %v325_v55, %v325_v55 }
  0x2c   : > { %2123 = vmatprep.mubr.msk.bf16.mxu0 %vm449_vm2, %v710_v49  ;;  %v2574_v3 = vsel %vm707_vm3, %v711_v52, %v712_v51  ;;  %v1012_v4 = vsel %vm474_vm0, %v2497_v2, 0  ;;  %v2578_v9 = vpack.c.bf16 %v327_v62, %v326_v60  ;;  %v348_v47 = vpack.c.bf16 %v328_v28, %v328_v28  ;;  %v1973_v2 = vld [vmem:[%s3066_s1 + $0xc] sm:$0x3] }
  0x2d   : > { %v2559_v56 = vsel %vm350_vm1, %v441_v8, %v445_v48  ;;  %v2581_v10 = vsel %vm707_vm3, %v714_v58, %v715_v59  ;;  %v995_v11 = vshrl.u32 %v2571_v63, 16  ;;  %v997_v14 = vshll.u32 %v2571_v63, 16  ;;  %v1991_v59 = vld [vmem:[%s3066_s1 + $0x10] sm:$0x3] }
  0x2e   : > { %2100 = vmatmul.mubr.msk.bf16.gmra.mxu1 %vm449_vm2, %v2559_v56  ;;  %v1129_v15 = vrot.slane %v2571_v63, 1  ;;  %v1130_v16 = vrot.slane %v346_v1, 1  ;;  %v1374_v18 = vshrl.u32 %v2578_v9, 16  ;;  %v1376_v19 = vshll.u32 %v2578_v9, 16 }
  0x2f   : > { %2105 = vmatprep.mubr.msk.bf16.mxu1 %vm449_vm2, %v2425_v7  ;;  %v1002_v7 = vshll.u32 %v346_v1, 16  ;;  %v999_v20 = vrot.slane %v997_v14, 1  ;;  %v1381_v25 = vshll.u32 %v348_v47, 16  ;;  %v1508_v26 = vrot.slane %v2578_v9, 1 }
  0x30   : > { %v880_v31 = vsel %vm474_vm0, %v1946_v29, 0  ;;  %v2596_v32 = vsel %vm707_vm3, %v1129_v15, %v1130_v16  ;;  %v1378_v34 = vrot.slane %v1376_v19, 1  ;;  %v1509_v35 = vrot.slane %v348_v47, 1 }
  0x31   : > { %v1004_v23 = vrot.slane %v1002_v7, 1  ;;  %v717_v36 = vrot.slane %v2503_v6, 1  ;;  %v718_v37 = vrot.slane %v2511_v22, 1  ;;  %v1000_v39 = vor.u32 %v999_v20, %v995_v11 }
  0x32   : > { %v1383_v40 = vrot.slane %v1381_v25, 1  ;;  %v720_v29 = vrot.slane %v2432_v12, 1  ;;  %v721_v41 = vrot.slane %v2434_v13, 1  ;;  %v1379_v44 = vor.u32 %v1378_v34, %v1374_v18 }
  0x33   : > { %2124 = vmatmul.mubr.msk.bf16.vlgmr.msra.gmra.mxu0 %vm449_vm2, %v2574_v3  ;;  %v2611_v45 = vsel %vm707_vm3, %v1508_v26, %v1509_v35  ;;  %v2616_v22 = vsel %vm350_vm1, %v1000_v39, %v1004_v23  ;;  %v2623_v13 = vsel %vm707_vm3, %v717_v36, %v718_v37  ;;  %v723_v8 = vrot.slane %v2462_v42, 1 }
  0x34   : > { %2158 = vmatpush3.bf16.msra.mxu0 %v1012_v4  ;;  %2127 = vmatprep.mubr.msk.bf16.mxu0 %vm449_vm2, %v2581_v10  ;;  %v2620_v48 = vsel %vm350_vm1, %v1379_v44, %v1383_v40  ;;  %v2626_v49 = vsel %vm707_vm3, %v720_v29, %v721_v41  ;;  %v724_v51 = vrot.slane %v2464_v43, 1  ;;  %v726_v52 = vrot.slane %v2491_v0, 1 }
  0x35   : > { %2256 = vmatprep.subr.msk.bf16.mxu0 %vm474_vm0, %v1973_v2  ;;  %v727_v53 = vrot.slane %v2501_v5, 1  ;;  %v729_v43 = vrot.slane %v2520_v27, 1  ;;  %v730_v58 = vrot.slane %v2531_v33, 1  ;;  %v1259_v33 = vsel %vm474_vm0, %v1973_v2, 0 }
  0x36   : > { %2106 = vmatmul.mubr.msk.bf16.vlgmr.msra.gmra.mxu1 %vm449_vm2, %v2445_v21  ;;  %v725_v54 = vsel %vm707_vm3, %v723_v8, %v724_v51  ;;  %v1138_v60 = vsel %vm474_vm0, %v1964_v38, 0 }
  0x37   : > { %2140 = vmatpush3.bf16.msra.mxu1 %v880_v31  ;;  %2109 = vmatprep.mubr.msk.bf16.mxu1 %vm449_vm2, %v2466_v46  ;;  %v728_v55 = vsel %vm707_vm3, %v726_v52, %v727_v53  ;;  %v731_v5 = vsel %vm707_vm3, %v729_v43, %v730_v58 }
  0x38   : > { %2255 = vmatprep.subr.msk.bf16.mxu1 %vm474_vm0, %v1964_v38 }
  0x3b   : > { %2128 = vmatmul.mubr.msk.bf16.gmra.mxu0 %vm449_vm2, %v2623_v13 }
  0x3c   : > { %2131 = vmatprep.mubr.msk.bf16.mxu0 %vm449_vm2, %v2626_v49 }
  0x3e   : > { %2110 = vmatmul.mubr.msk.bf16.gmra.mxu1 %vm449_vm2, %v2503_v6 }
  0x3f   : > { %2113 = vmatprep.mubr.msk.bf16.mxu1 %vm449_vm2, %v2432_v12 }
  0x43   : > { %2132 = vmatmul.mubr.msk.bf16.gmra.mxu0 %vm449_vm2, %v725_v54 }
  0x44   : > { %2135 = vmatprep.mubr.msk.bf16.mxu0 %vm449_vm2, %v728_v55 }
  0x46   : > { %2114 = vmatmul.mubr.msk.bf16.gmra.mxu1 %vm449_vm2, %v2462_v42 }
  0x47   : > { %2117 = vmatprep.mubr.msk.bf16.mxu1 %vm449_vm2, %v2491_v0 }
  0x4b   : > { %2136 = vmatmul.mubr.msk.bf16.gmra.mxu0 %vm449_vm2, %v731_v5 }
  0x4c   : > { %2159 = vmatprep.mubr.msk.bf16.mxu0 %vm449_vm2, %v2488_v61  ;;  %v1982_v61 = vld [vmem:[%s3066_s1 + $0xe] sm:$0x3] }
  0x4d   : > { %v1391_v62 = vsel %vm474_vm0, %v1982_v61, 0 }
  0x4e   : > { %2118 = vmatmul.mubr.msk.bf16.gmra.mxu1 %vm449_vm2, %v2520_v27 }
  0x4f   : > { %2141 = vmatprep.mubr.msk.bf16.mxu1 %vm449_vm2, %v2445_v21  ;;  %v1517_v21 = vsel %vm474_vm0, %v1991_v59, 0 }
  0x53   : > { %2160 = vmatmul.mubr.msk.bf16.vlgmr.msra.gmra.mxu0 %vm449_vm2, %v2528_v30 }
  0x54   : > { %2194 = vmatpush3.bf16.msra.mxu0 %v1259_v33  ;;  %2163 = vmatprep.mubr.msk.bf16.mxu0 %vm449_vm2, %v2549_v50 }
  0x55   : > { %2258 = vmatprep.subr.msk.bf16.mxu0 %vm474_vm0, %v1991_v59 }
  0x56   : > { %2142 = vmatmul.mubr.msk.bf16.vlgmr.msra.gmra.mxu1 %vm449_vm2, %v2466_v46 }
  0x57   : > { %2176 = vmatpush3.bf16.msra.mxu1 %v1138_v60  ;;  %2145 = vmatprep.mubr.msk.bf16.mxu1 %vm449_vm2, %v2503_v6 }
  0x58   : > { %2257 = vmatprep.subr.msk.bf16.mxu1 %vm474_vm0, %v1982_v61 }
  0x5b   : > { %2164 = vmatmul.mubr.msk.bf16.gmra.mxu0 %vm449_vm2, %v2480_v57 }
  0x5c   : > { %2167 = vmatprep.mubr.msk.bf16.mxu0 %vm449_vm2, %v2517_v24 }
  0x5e   : > { %2146 = vmatmul.mubr.msk.bf16.gmra.mxu1 %vm449_vm2, %v2432_v12 }
  0x5f   : > { %2149 = vmatprep.mubr.msk.bf16.mxu1 %vm449_vm2, %v2462_v42 }
  0x63   : > { %2168 = vmatmul.mubr.msk.bf16.gmra.mxu0 %vm449_vm2, %v2543_v17 }
  0x64   : > { %2171 = vmatprep.mubr.msk.bf16.mxu0 %vm449_vm2, %v2559_v56 }
  0x66   : > { %2150 = vmatmul.mubr.msk.bf16.gmra.mxu1 %vm449_vm2, %v2491_v0 }
  0x67   : > { %2153 = vmatprep.mubr.msk.bf16.mxu1 %vm449_vm2, %v2520_v27 }
  0x6b   : > { %2172 = vmatmul.mubr.msk.bf16.gmra.mxu0 %vm449_vm2, %v2616_v22 }
  0x6c   : > { %2195 = vmatprep.mubr.msk.bf16.mxu0 %vm449_vm2, %v2466_v46 }
  0x6e   : > { %2154 = vmatmul.mubr.msk.bf16.gmra.mxu1 %vm449_vm2, %v2571_v63 }
  0x6f   : > { %2177 = vmatprep.mubr.msk.bf16.mxu1 %vm449_vm2, %v2574_v3 }
  0x73   : > { %2196 = vmatmul.mubr.msk.bf16.vlgmr.msra.gmra.mxu0 %vm449_vm2, %v2503_v6 }
  0x74   : > { %2230 = vmatpush3.bf16.msra.mxu0 %v1517_v21  ;;  %2199 = vmatprep.mubr.msk.bf16.mxu0 %vm449_vm2, %v2432_v12 }
  0x76   : > { %2178 = vmatmul.mubr.msk.bf16.vlgmr.msra.gmra.mxu1 %vm449_vm2, %v2581_v10 }
  0x77   : > { %2212 = vmatpush3.bf16.msra.mxu1 %v1391_v62  ;;  %2181 = vmatprep.mubr.msk.bf16.mxu1 %vm449_vm2, %v2623_v13 }
  0x7b   : > { %2200 = vmatmul.mubr.msk.bf16.gmra.mxu0 %vm449_vm2, %v2462_v42 }
  0x7c   : > { %2203 = vmatprep.mubr.msk.bf16.mxu0 %vm449_vm2, %v2491_v0 }
  0x7e   : > { %2182 = vmatmul.mubr.msk.bf16.gmra.mxu1 %vm449_vm2, %v2626_v49 }
  0x7f   : > { %2185 = vmatprep.mubr.msk.bf16.mxu1 %vm449_vm2, %v725_v54 }
  0x83   : > { %2204 = vmatmul.mubr.msk.bf16.gmra.mxu0 %vm449_vm2, %v2520_v27 }
  0x84   : > { %2207 = vmatprep.mubr.msk.bf16.mxu0 %vm449_vm2, %v2571_v63 }
  0x86   : > { %2186 = vmatmul.mubr.msk.bf16.gmra.mxu1 %vm449_vm2, %v728_v55 }
  0x87   : > { %2189 = vmatprep.mubr.msk.bf16.mxu1 %vm449_vm2, %v731_v5 }
  0x8b   : > { %2208 = vmatmul.mubr.msk.bf16.gmra.mxu0 %vm449_vm2, %v2578_v9 }
  0x8c   : > { %2231 = vmatprep.mubr.msk.bf16.mxu0 %vm449_vm2, %v2581_v10 }
  0x8e   : > { %2190 = vmatmul.mubr.msk.bf16.gmra.mxu1 %vm449_vm2, %v2596_v32 }
  0x8f   : > { %2213 = vmatprep.mubr.msk.bf16.mxu1 %vm449_vm2, %v2528_v30 }
  0x93   : > { %2232 = vmatmul.mubr.msk.bf16.vlgmr.msra.gmra.mxu0 %vm449_vm2, %v2623_v13 }
  0x94   : > { %2235 = vmatprep.mubr.msk.bf16.mxu0 %vm449_vm2, %v2626_v49 }
  0x96   : > { %2214 = vmatmul.mubr.msk.bf16.vlgmr.msra.gmra.mxu1 %vm449_vm2, %v2549_v50 }
  0x97   : > { %2217 = vmatprep.mubr.msk.bf16.mxu1 %vm449_vm2, %v2480_v57 }
  0x9b   : > { %2236 = vmatmul.mubr.msk.bf16.gmra.mxu0 %vm449_vm2, %v725_v54 }
  0x9c   : > { %2239 = vmatprep.mubr.msk.bf16.mxu0 %vm449_vm2, %v728_v55 }
  0x9e   : > { %2218 = vmatmul.mubr.msk.bf16.gmra.mxu1 %vm449_vm2, %v2517_v24 }
  0x9f   : > { %2221 = vmatprep.mubr.msk.bf16.mxu1 %vm449_vm2, %v2543_v17 }
  0xa3   : > { %2240 = vmatmul.mubr.msk.bf16.gmra.mxu0 %vm449_vm2, %v731_v5 }
  0xa4   : > { %2243 = vmatprep.mubr.msk.bf16.mxu0 %vm449_vm2, %v2596_v32 }
  0xa6   : > { %2222 = vmatmul.mubr.msk.bf16.gmra.mxu1 %vm449_vm2, %v2559_v56 }
  0xa7   : > { %2225 = vmatprep.mubr.msk.bf16.mxu1 %vm449_vm2, %v2616_v22 }
  0xab   : > { %2244 = vmatmul.mubr.msk.bf16.gmra.mxu0 %vm449_vm2, %v2611_v45 }
  0xae   : > { %2226 = vmatmul.mubr.msk.bf16.gmra.mxu1 %vm449_vm2, %v2620_v48 }
  0xe2   : > { %v2089_v12 = vpop.f32.mrf.mxu0 }
  0xe4   : > { %v512_v42 = vpop.f32.mrf.mxu0 }
  0xe6   : > { %v2097_v46 = vpop.f32.mrf.mxu1  ;;  %v2090_v57 = vpop.f32.mrf.mxu0 }
  0xe8   : > { %v544_v0 = vpop.f32.mrf.mxu1  ;;  %v515_v6 = vpop.f32.mrf.mxu0 }
  0xea   : > { %v2098_v24 = vpop.f32.mrf.mxu1 }
  0xeb   : > { %v2093_v30 = vpop.f32.mrf.mxu0 }
  0xec   : > { %v547_v27 = vpop.f32.mrf.mxu1 }
  0xed   : > { %v528_v50 = vpop.f32.mrf.mxu0 }
  0xee   : > { %v2101_v17 = vpop.f32.mrf.mxu1 }
  0xef   : > { %v2094_v28 = vpop.f32.mrf.mxu0 }
  0xf0   : > { %v560_v56 = vpop.f32.mrf.mxu1 }
  0xf1   : > { %v531_v1 = vpop.f32.mrf.mxu0 }
  0xf2   : > { %v2102_v63 = vpop.f32.mrf.mxu1 }
  0xf3   : > { %v2125_v4 = vpop.f32.mrf.mxu0 }
  0xf4   : > { %v2756_v3 = vpop.f32.mrf.mxu1 }
  0xf5   : > { %v795_v47 = vpop.f32.mrf.mxu0 }
  0xf6   : > { %v2107_v9 = vpop.f32.mrf.mxu1 }
  0xf7   : > { %v637_v10 = vadd.f32 %v2107_v9, %v2089_v12  ;;  %v2126_v14 = vpop.f32.mrf.mxu0 }
  0xf8   : > { %v628_v11 = vpop.f32.mrf.mxu1 }
  0xf9   : > { %v2758_v7 = vadd.f32 %v2125_v4, %v637_v10  ;;  %v629_v15 = vadd.f32 %v628_v11, %v512_v42  ;;  %v798_v18 = vpop.f32.mrf.mxu0 }
  0xfa   : > { %v2108_v16 = vpop.f32.mrf.mxu1 }
  0xfb   : > { %v2760_v19 = vadd.f32 %v795_v47, %v629_v15  ;;  %v640_v2 = vadd.f32 %v2108_v16, %v2090_v57  ;;  %v2129_v23 = vpop.f32.mrf.mxu0 }
  0xfc   : > { %v631_v20 = vpop.f32.mrf.mxu1 }
  0xfd   : > { %v2762_v25 = vadd.f32 %v2126_v14, %v640_v2  ;;  %v632_v26 = vadd.f32 %v631_v20, %v515_v6  ;;  %v811_v32 = vpop.f32.mrf.mxu0 }
  0xfe   : > { %v2111_v31 = vpop.f32.mrf.mxu1 }
  0xff   : > { %v2764_v34 = vadd.f32 %v798_v18, %v632_v26  ;;  %v653_v35 = vadd.f32 %v2111_v31, %v2093_v30  ;;  %v2130_v37 = vpop.f32.mrf.mxu0 }
 0x100   : > { %v644_v36 = vpop.f32.mrf.mxu1 }
 0x101   : > { %v2766_v38 = vadd.f32 %v2129_v23, %v653_v35  ;;  %v645_v39 = vadd.f32 %v644_v36, %v528_v50  ;;  %v814_v29 = vpop.f32.mrf.mxu0 }
 0x102   : > { %v2112_v40 = vpop.f32.mrf.mxu1 }
 0x103   : > { %v2768_v41 = vadd.f32 %v811_v32, %v645_v39  ;;  %v656_v44 = vadd.f32 %v2112_v40, %v2094_v28  ;;  %v2133_v22 = vpop.f32.mrf.mxu0 }
 0x104   : > { %v647_v45 = vpop.f32.mrf.mxu1 }
 0x105   : > { %v2770_v48 = vadd.f32 %v2130_v37, %v656_v44  ;;  %v648_v13 = vadd.f32 %v647_v45, %v531_v1  ;;  %v827_v8 = vpop.f32.mrf.mxu0 }
 0x106   : > { %v2115_v49 = vpop.f32.mrf.mxu1 }
 0x107   : > { %v2772_v51 = vadd.f32 %v814_v29, %v648_v13  ;;  %v669_v52 = vadd.f32 %v2115_v49, %v2097_v46  ;;  %v2134_v54 = vpop.f32.mrf.mxu0 }
 0x108   : > { %v660_v53 = vpop.f32.mrf.mxu1 }
 0x109   : > { %v2774_v55 = vadd.f32 %v2133_v22, %v669_v52  ;;  %v661_v43 = vadd.f32 %v660_v53, %v544_v0  ;;  %v830_v5 = vpop.f32.mrf.mxu0 }
 0x10a   : > { %v2116_v58 = vpop.f32.mrf.mxu1 }
 0x10b   : > { %v2776_v33 = vadd.f32 %v827_v8, %v661_v43  ;;  %v672_v59 = vadd.f32 %v2116_v58, %v2098_v24  ;;  %v2137_v61 = vpop.f32.mrf.mxu0 }
 0x10c   : > { %v663_v60 = vpop.f32.mrf.mxu1 }
 0x10d   : > { %v2778_v21 = vadd.f32 %v2134_v54, %v672_v59  ;;  %v664_v62 = vadd.f32 %v663_v60, %v547_v27  ;;  %v843_v42 = vpop.f32.mrf.mxu0 }
 0x10e   : > { %v2119_v12 = vpop.f32.mrf.mxu1 }
 0x10f   : > { %v2780_v57 = vadd.f32 %v830_v5, %v664_v62  ;;  %v685_v46 = vadd.f32 %v2119_v12, %v2101_v17  ;;  %v2138_v30 = vpop.f32.mrf.mxu0 }
 0x110   : > { %v676_v6 = vpop.f32.mrf.mxu1 }
 0x111   : > { %v2782_v50 = vadd.f32 %v2137_v61, %v685_v46  ;;  %v677_v0 = vadd.f32 %v676_v6, %v560_v56  ;;  %v846_v1 = vpop.f32.mrf.mxu0 }
 0x112   : > { %v2120_v28 = vpop.f32.mrf.mxu1 }
 0x113   : > { %v2784_v4 = vadd.f32 %v843_v42, %v677_v0  ;;  %v688_v24 = vadd.f32 %v2120_v28, %v2102_v63  ;;  %v2786_v47 = vpop.f32.mrf.mxu0 }
 0x114   : > { %v679_v9 = vpop.f32.mrf.mxu1 }
 0x115   : > { %v2788_v10 = vadd.f32 %v2138_v30, %v688_v24  ;;  %v680_v27 = vadd.f32 %v679_v9, %v2756_v3  ;;  %v2791_v14 = vpop.f32.mrf.mxu0 }
 0x116   : > { %v2143_v11 = vpop.f32.mrf.mxu1 }
 0x117   : > { %v2793_v17 = vadd.f32 %v846_v1, %v680_v27  ;;  %v2795_v16 = vpop.f32.mrf.mxu0 }
 0x118   : > { %v916_v15 = vpop.f32.mrf.mxu1 }
 0x119   : > { %v2797_v18 = vpop.f32.mrf.mxu0 }
 0x11a   : > { %v2144_v56 = vpop.f32.mrf.mxu1 }
 0x11b   : > { %v2799_v63 = vpop.f32.mrf.mxu0 }
 0x11c   : > { %v919_v2 = vpop.f32.mrf.mxu1 }
 0x11d   : > { %v2801_v23 = vpop.f32.mrf.mxu0 }
 0x11e   : > { %v2147_v20 = vpop.f32.mrf.mxu1 }
 0x11f   : > { %v2803_v31 = vpop.f32.mrf.mxu0 }
 0x120   : > { %v932_v26 = vpop.f32.mrf.mxu1 }
 0x121   : > { %v2805_v32 = vpop.f32.mrf.mxu0 }
 0x122   : > { %v2148_v3 = vpop.f32.mrf.mxu1 }
 0x123   : > { %v2807_v36 = vpop.f32.mrf.mxu0 }
 0x124   : > { %v935_v35 = vpop.f32.mrf.mxu1 }
 0x125   : > { %v2809_v39 = vpop.f32.mrf.mxu0 }
 0x126   : > { %v2151_v37 = vpop.f32.mrf.mxu1 }
 0x127   : > { %v2811_v29 = vpop.f32.mrf.mxu0 }
 0x128   : > { %v948_v40 = vpop.f32.mrf.mxu1 }
 0x129   : > { %v2813_v45 = vpop.f32.mrf.mxu0 }
 0x12a   : > { %v2152_v44 = vpop.f32.mrf.mxu1 }
 0x12b   : > { %v2815_v13 = vpop.f32.mrf.mxu0 }
 0x12c   : > { %v951_v22 = vpop.f32.mrf.mxu1 }
 0x12d   : > { %v2817_v8 = vpop.f32.mrf.mxu0 }
 0x12e   : > { %v2155_v49 = vpop.f32.mrf.mxu1 }
 0x12f   : > { %v2819_v53 = vpop.f32.mrf.mxu0 }
 0x130   : > { %v964_v52 = vpop.f32.mrf.mxu1 }
 0x131   : > { %v2821_v43 = vpop.f32.mrf.mxu0 }
 0x132   : > { %v2156_v54 = vpop.f32.mrf.mxu1 }
 0x133   : > { %v2197_v5 = vpop.f32.mrf.mxu0 }
 0x134   : > { %v967_v58 = vpop.f32.mrf.mxu1 }
 0x135   : > { %v2823_v60 = vpop.f32.mrf.mxu0 }
 0x136   : > { %v2179_v59 = vpop.f32.mrf.mxu1 }
 0x137   : > { %v2825_v62 = vpop.f32.mrf.mxu0 }
 0x138   : > { %v1174_v61 = vpop.f32.mrf.mxu1  ;;  %3071 = vst [vmem:[#allocation2_spill] sm:$0xff] %v2825_v62 }
 0x139   : > { %v2827_v42 = vpop.f32.mrf.mxu0 }
 0x13a   : > { %v2180_v12 = vpop.f32.mrf.mxu1  ;;  %3072 = vst [vmem:[#allocation3_spill] sm:$0xff] %v2827_v42 }
 0x13b   : > { %v2831_v6 = vpop.f32.mrf.mxu0 }
 0x13c   : > { %v2829_v46 = vpop.f32.mrf.mxu1  ;;  %3074 = vst [vmem:[#allocation5_spill] sm:$0xff] %v2831_v6 }
 0x13d   : > { %3073 = vst [vmem:[#allocation4_spill] sm:$0xff] %v2829_v46  ;;  %v2835_v0 = vpop.f32.mrf.mxu0 }
 0x13e   : > { %v2833_v30 = vpop.f32.mrf.mxu1  ;;  %3076 = vst [vmem:[#allocation7_spill] sm:$0xff] %v2835_v0 }
 0x13f   : > { %3075 = vst [vmem:[#allocation6_spill] sm:$0xff] %v2833_v30  ;;  %v2839_v1 = vpop.f32.mrf.mxu0 }
 0x140   : > { %v2837_v28 = vpop.f32.mrf.mxu1  ;;  %3078 = vst [vmem:[#allocation9_spill] sm:$0xff] %v2839_v1  ;;  %v981_v1 = vadd.f32 %v2143_v11, %v2758_v7  ;;  %v985_v7 = vadd.f32 %v2147_v20, %v2766_v38 }
 0x141   : > { %3077 = vst [vmem:[#allocation8_spill] sm:$0xff] %v2837_v28  ;;  %v2843_v9 = vpop.f32.mrf.mxu0 }
 0x142   : > { %v2841_v24 = vpop.f32.mrf.mxu1  ;;  %3080 = vst [vmem:[#allocation11_spill] sm:$0xff] %v2843_v9  ;;  %v979_v9 = vadd.f32 %v916_v15, %v2760_v19 }
 0x143   : > { %3079 = vst [vmem:[#allocation10_spill] sm:$0xff] %v2841_v24  ;;  %v2847_v62 = vpop.f32.mrf.mxu0 }
 0x144   : > { %v2845_v27 = vpop.f32.mrf.mxu1  ;;  %3082 = vst [vmem:[#allocation13_spill] sm:$0xff] %v2847_v62  ;;  %v982_v62 = vadd.f32 %v2144_v56, %v2762_v25  ;;  %v983_v25 = vadd.f32 %v932_v26, %v2768_v41  ;;  %v986_v56 = vadd.f32 %v2148_v3, %v2770_v48  ;;  %v993_v41 = vadd.f32 %v2155_v49, %v2782_v50 }
 0x145   : > { %3081 = vst [vmem:[#allocation12_spill] sm:$0xff] %v2845_v27  ;;  %v2851_v46 = vpop.f32.mrf.mxu0  ;;  %v1117_v26 = vadd.f32 %v2799_v63, %v985_v7 }
 0x146   : > { %v2849_v42 = vpop.f32.mrf.mxu1  ;;  %3084 = vst [vmem:[#allocation15_spill] sm:$0xff] %v2851_v46  ;;  %v1114_v15 = vadd.f32 %v2795_v16, %v982_v62  ;;  %v988_v16 = vadd.f32 %v951_v22, %v2780_v57  ;;  %v1125_v22 = vadd.f32 %v2815_v13, %v993_v41  ;;  %v3091_v13 = vld [vmem:[#allocation2_spill] sm:$0xff] }
 0x147   : > { %3083 = vst [vmem:[#allocation14_spill] sm:$0xff] %v2849_v42  ;;  %v2855_v30 = vpop.f32.mrf.mxu0 }
 0x148   : > { %v2853_v6 = vpop.f32.mrf.mxu1  ;;  %3085 = vst [vmem:[#allocation16_spill] sm:$0xff] %v2855_v30  ;;  %v1113_v30 = vadd.f32 %v2786_v47, %v981_v1  ;;  %v989_v47 = vadd.f32 %v2151_v37, %v2774_v55  ;;  %v994_v55 = vadd.f32 %v2156_v54, %v2788_v10  ;;  %v1240_v37 = vadd.f32 %v2180_v12, %v1114_v15 }
 0x149   : > { %v2859_v28 = vpop.f32.mrf.mxu0 }
 0x14a   : > { %v2857_v0 = vpop.f32.mrf.mxu1  ;;  %3087 = vst [vmem:[#allocation18_spill] sm:$0xff] %v2859_v28  ;;  %v1111_v28 = vadd.f32 %v2791_v14, %v979_v9  ;;  %v990_v14 = vadd.f32 %v2152_v44, %v2778_v21  ;;  %v1121_v63 = vadd.f32 %v2807_v36, %v989_v47  ;;  %v1120_v44 = vadd.f32 %v2813_v45, %v988_v16 }
 0x14b   : > { %3086 = vst [vmem:[#allocation17_spill] sm:$0xff] %v2857_v0  ;;  %v2865_v27 = vpop.f32.mrf.mxu0  ;;  %v980_v0 = vadd.f32 %v919_v2, %v2764_v34  ;;  %v987_v34 = vadd.f32 %v948_v40, %v2776_v33  ;;  %v992_v33 = vadd.f32 %v967_v58, %v2793_v17  ;;  %v1361_v58 = vadd.f32 %v3091_v13, %v1240_v37 }
 0x14c   : > { %v2863_v24 = vpop.f32.mrf.mxu1  ;;  %3088 = vst [vmem:[#allocation19_spill] sm:$0xff] %v2865_v27  ;;  %v1239_v27 = vadd.f32 %v2179_v59, %v1113_v30  ;;  %v1237_v48 = vadd.f32 %v1174_v61, %v1111_v28  ;;  %v1122_v10 = vadd.f32 %v2811_v29, %v990_v14  ;;  %v2915_v29 = vld [vmem:[%s3067_s2] ss:$0 sm:$0xff] }
 0x14d   : > { %v2870_v46 = vpop.f32.mrf.mxu0  ;;  %v1112_v20 = vadd.f32 %v2797_v18, %v980_v0  ;;  %v1118_v18 = vadd.f32 %v2803_v31, %v986_v56  ;;  %v1124_v36 = vadd.f32 %v2821_v43, %v992_v33  ;;  %v3095_v43 = vld [vmem:[#allocation12_spill] sm:$0xff]  ;;  %v1246_v14 = vadd.f32 %v2863_v24, %v1120_v44 }
 0x14e   : > { %v2868_v42 = vpop.f32.mrf.mxu1  ;;  %3089 = vst [vmem:[#allocation20_spill] sm:$0xff] %v2870_v46  ;;  %v984_v46 = vadd.f32 %v935_v35, %v2772_v51  ;;  %v991_v51 = vadd.f32 %v964_v52, %v2784_v4  ;;  %v1115_v35 = vadd.f32 %v2801_v23, %v983_v25  ;;  %v1360_v57 = vadd.f32 %v2197_v5, %v1239_v27  ;;  %v3090_v52 = vld [vmem:[#allocation4_spill] sm:$0xff]  ;;  %v3092_v5 = vld [vmem:[#allocation6_spill] sm:$0xff]  ;;  %v3097_v25 = vld [vmem:[#allocation3_spill] sm:$0xff] }
 0x14f   : > { %v2878_v19 = vpop.f32.mrf.mxu0  ;;  %v1119_v4 = vadd.f32 %v2809_v39, %v987_v34  ;;  %v1358_v23 = vadd.f32 %v2823_v60, %v1237_v48  ;;  %v1238_v39 = vadd.f32 %v3090_v52, %v1112_v20  ;;  %v1243_v59 = vadd.f32 %v3092_v5, %v1117_v26  ;;  %v3096_v30 = vld [vmem:[#allocation14_spill] sm:$0xff] }
 0x150   : > { %v2876_v11 = vpop.f32.mrf.mxu1  ;;  %v1116_v50 = vadd.f32 %v2805_v32, %v984_v46  ;;  %v1123_v31 = vadd.f32 %v2817_v8, %v991_v51  ;;  %v1126_v32 = vadd.f32 %v2819_v53, %v994_v55  ;;  %v3093_v8 = vld [vmem:[#allocation8_spill] sm:$0xff]  ;;  %v3094_v53 = vld [vmem:[#allocation10_spill] sm:$0xff]  ;;  %v1247_v0 = vadd.f32 %v3096_v30, %v1121_v63  ;;  %v3099_v55 = vld [vmem:[#allocation5_spill] sm:$0xff] }
 0x151   : > { %v2887_v2 = vpop.f32.mrf.mxu0  ;;  %v1241_v62 = vadd.f32 %v3093_v8, %v1115_v35  ;;  %v1244_v12 = vadd.f32 %v3094_v53, %v1118_v18  ;;  %v1245_v9 = vadd.f32 %v2853_v6, %v1119_v4  ;;  %v1359_v56 = vadd.f32 %v3097_v25, %v1238_v39  ;;  %v3101_v18 = vld [vmem:[#allocation9_spill] sm:$0xff] }
 0x152   : > { %v2192_v38 = vpop.f32.mrf.mxu1  ;;  %v1242_v46 = vadd.f32 %v3095_v43, %v1116_v50  ;;  %v3098_v47 = vld [vmem:[#allocation17_spill] sm:$0xff]  ;;  %v1251_v20 = vadd.f32 %v2868_v42, %v1125_v22  ;;  %v1249_v48 = vadd.f32 %v2876_v11, %v1123_v31  ;;  %v1364_v33 = vadd.f32 %v3099_v55, %v1243_v59  ;;  %v3102_v50 = vld [vmem:[#allocation11_spill] sm:$0xff]  ;;  %v3106_v22 = vld [vmem:[#allocation18_spill] sm:$0xff] }
 0x153   : > { %v2233_v3 = vpop.f32.mrf.mxu0  ;;  %v1248_v34 = vadd.f32 %v3098_v47, %v1122_v10  ;;  %v1252_v26 = vadd.f32 %v2192_v38, %v1126_v32  ;;  %v3103_v4 = vld [vmem:[#allocation13_spill] sm:$0xff]  ;;  %v3104_v38 = vld [vmem:[#allocation15_spill] sm:$0xff] }
 0x154   : > { %v2896_v21 = vpop.f32.mrf.mxu1  ;;  %v1363_v63 = vadd.f32 %v3102_v50, %v1242_v46  ;;  %v1368_v11 = vadd.f32 %v3103_v4, %v1247_v0  ;;  %v1366_v10 = vadd.f32 %v3104_v38, %v1245_v9  ;;  %v3107_v39 = vld [vmem:[#allocation19_spill] sm:$0xff] }
 0x155   : > { %v1553_v17 = vpop.f32.mrf.mxu0 }
 0x156   : > { %v2215_v40 = vpop.f32.mrf.mxu1 }
 0x157   : > { %v1492_v49 = vadd.f32 %v2215_v40, %v1360_v57  ;;  %v2234_v54 = vpop.f32.mrf.mxu0  ;;  %v1365_v57 = vadd.f32 %v3101_v18, %v1244_v12  ;;  %v1250_v12 = vadd.f32 %v2896_v21, %v1124_v36 }
 0x158   : > { %v1427_v45 = vpop.f32.mrf.mxu1 }
 0x159   : > { %v1618_v60 = vadd.f32 %v2233_v3, %v1492_v49  ;;  %v1490_v61 = vadd.f32 %v1427_v45, %v1358_v23  ;;  %v1556_v1 = vpop.f32.mrf.mxu0  ;;  %v3100_v3 = vld [vmem:[#allocation7_spill] sm:$0xff]  ;;  %v2951_v23 = vadd.f32 %v3106_v22, %v1246_v14  ;;  %v2954_v45 = vadd.f32 %v3107_v39, %v1251_v20 }
 0x15a   : > { %v2216_v28 = vpop.f32.mrf.mxu1  ;;  %v1362_v35 = vadd.f32 %v3100_v3, %v1241_v62 }
 0x15b   : > { %v1641_v27 = vadd.f32 %v2915_v29, %v1618_v60  ;;  %v1616_v7 = vadd.f32 %v1553_v17, %v1490_v61  ;;  %v1493_v15 = vadd.f32 %v2216_v28, %v1361_v58  ;;  %v2237_v41 = vpop.f32.mrf.mxu0  ;;  %v3105_v17 = vld [vmem:[#allocation16_spill] sm:$0xff]  ;;  %v2960_v58 = vadd.f32 %v2878_v19, %v1252_v26 }
 0x15c   : > { %v1430_v16 = vpop.f32.mrf.mxu1  ;;  %v2948_v44 = vadd.f32 %v3105_v17, %v1248_v34 }
 0x15d   : > { %1658 = vst.msk [vmem:[%s2926_s10 + $0x10] sm:$0xff] %vm1655_vm4, %v1641_v27  ;;  %v1639_v6 = vadd.f32 %v2915_v29, %v1616_v7  ;;  %v1619_v51 = vadd.f32 %v2234_v54, %v1493_v15  ;;  %v1491_v24 = vadd.f32 %v1430_v16, %v1359_v56  ;;  %v1569_v42 = vpop.f32.mrf.mxu0  ;;  %v3108_v54 = vld [vmem:[#allocation20_spill] sm:$0xff]  ;;  %v1713_v59 = vmul.f32 %v1641_v27, %v1641_v27 }
 0x15e   : > { %v2219_v37 = vpop.f32.mrf.mxu1  ;;  %v2957_v13 = vadd.f32 %v3108_v54, %v1249_v48  ;;  %v1675_v56 = vsel %vm1655_vm4, %v1641_v27, 0.0 }
 0x15f   : > { %1656 = vst.msk [vmem:[%s2926_s10] sm:$0xff] %vm1655_vm4, %v1639_v6  ;;  %v1642_v40 = vadd.f32 %v2915_v29, %v1619_v51  ;;  %v1617_v49 = vadd.f32 %v1556_v1, %v1491_v24  ;;  %v1496_v31 = vadd.f32 %v2219_v37, %v1364_v33  ;;  %v2238_v52 = vpop.f32.mrf.mxu0  ;;  %v1711_v60 = vmul.f32 %v1639_v6, %v1639_v6 }
 0x160   : > { %v1443_v32 = vpop.f32.mrf.mxu1  ;;  %v1672_v43 = vsel %vm1655_vm4, %v1639_v6, 0.0  ;;  %v1730_v47 = vsel %vm1655_vm4, %v1713_v59, 0.0 }
 0x161   : > { %1659 = vst.msk [vmem:[%s2926_s10 + $0x18] sm:$0xff] %vm1655_vm4, %v1642_v40  ;;  %v1494_v5 = vadd.f32 %v1443_v32, %v1362_v35  ;;  %v1640_v61 = vadd.f32 %v2915_v29, %v1617_v49  ;;  %v1622_v8 = vadd.f32 %v2237_v41, %v1496_v31  ;;  %v1572_v53 = vpop.f32.mrf.mxu0  ;;  %v1714_v0 = vmul.f32 %v1642_v40, %v1642_v40 }
 0x162   : > { %v2220_v62 = vpop.f32.mrf.mxu1  ;;  %v1727_v34 = vsel %vm1655_vm4, %v1711_v60, 0.0  ;;  %v1677_v41 = vsel %vm1655_vm4, %v1642_v40, 0.0 }
 0x163   : > { %v1620_v46 = vadd.f32 %v1569_v42, %v1494_v5  ;;  %v1497_v30 = vadd.f32 %v2220_v62, %v1365_v57  ;;  %1657 = vst.msk [vmem:[%s2926_s10 + $0x8] sm:$0xff] %vm1655_vm4, %v1640_v61  ;;  %v1673_v19 = vsel %vm1655_vm4, %v1640_v61, 0.0  ;;  %v1712_v28 = vmul.f32 %v1640_v61, %v1640_v61  ;;  %v2241_v7 = vpop.f32.mrf.mxu0 }
 0x164   : > { %v1645_v1 = vadd.f32 %v2915_v29, %v1622_v8  ;;  %v1446_v9 = vpop.f32.mrf.mxu1  ;;  %v1674_v15 = vadd.f32 %v1673_v19, %v1672_v43  ;;  %v1732_v27 = vsel %vm1655_vm4, %v1714_v0, 0.0  ;;  %v1371_v8 = vadd.f32 %v2887_v2, %v1250_v12 }
 0x165   : > { %v1643_v25 = vadd.f32 %v2915_v29, %v1620_v46  ;;  %v1623_v21 = vadd.f32 %v2238_v52, %v1497_v30  ;;  %v1495_v36 = vadd.f32 %v1446_v9, %v1363_v63  ;;  %v1728_v14 = vsel %vm1655_vm4, %v1712_v28, 0.0  ;;  %v1585_v16 = vpop.f32.mrf.mxu0 }
 0x166   : > { %1662 = vst.msk [vmem:[%s2926_s10 + $0x30] sm:$0xff] %vm1655_vm4, %v1645_v1  ;;  %v2223_v20 = vpop.f32.mrf.mxu1  ;;  %v1676_v48 = vadd.f32 %v1675_v56, %v1674_v15  ;;  %v1729_v26 = vadd.f32 %v1728_v14, %v1727_v34  ;;  %v1717_v57 = vmul.f32 %v1645_v1, %v1645_v1 }
 0x167   : > { %1660 = vst.msk [vmem:[%s2926_s10 + $0x20] sm:$0xff] %vm1655_vm4, %v1643_v25  ;;  %v1715_v6 = vmul.f32 %v1643_v25, %v1643_v25  ;;  %v1646_v51 = vadd.f32 %v2915_v29, %v1623_v21  ;;  %v1621_v55 = vadd.f32 %v1572_v53, %v1495_v36  ;;  %v1500_v33 = vadd.f32 %v2223_v20, %v1368_v11  ;;  %v2242_v35 = vpop.f32.mrf.mxu0 }
 0x168   : > { %v1459_v3 = vpop.f32.mrf.mxu1  ;;  %v1731_v18 = vadd.f32 %v1730_v47, %v1729_v26  ;;  %v1678_v24 = vadd.f32 %v1677_v41, %v1676_v48  ;;  %v1679_v42 = vsel %vm1655_vm4, %v1643_v25, 0.0  ;;  %v1738_v46 = vsel %vm1655_vm4, %v1717_v57, 0.0 }
 0x169   : > { %v1498_v37 = vadd.f32 %v1459_v3, %v1366_v10  ;;  %v1734_v50 = vsel %vm1655_vm4, %v1715_v6, 0.0  ;;  %1663 = vst.msk [vmem:[%s2926_s10 + $0x38] sm:$0xff] %vm1655_vm4, %v1646_v51  ;;  %v1644_v63 = vadd.f32 %v2915_v29, %v1621_v55  ;;  %v1626_v4 = vadd.f32 %v2241_v7, %v1500_v33  ;;  %v1588_v40 = vpop.f32.mrf.mxu0 }
 0x16a   : > { %v2224_v38 = vpop.f32.mrf.mxu1  ;;  %v1680_v17 = vadd.f32 %v1679_v42, %v1678_v24  ;;  %v1733_v11 = vadd.f32 %v1732_v27, %v1731_v18  ;;  %v1718_v31 = vmul.f32 %v1646_v51, %v1646_v51  ;;  %v1685_v30 = vsel %vm1655_vm4, %v1646_v51, 0.0 }
 0x16b   : > { %v1624_v22 = vadd.f32 %v1585_v16, %v1498_v37  ;;  %v1501_v49 = vadd.f32 %v2224_v38, %v2948_v44  ;;  %1661 = vst.msk [vmem:[%s2926_s10 + $0x28] sm:$0xff] %vm1655_vm4, %v1644_v63  ;;  %v1681_v10 = vsel %vm1655_vm4, %v1644_v63, 0.0  ;;  %v1716_v32 = vmul.f32 %v1644_v63, %v1644_v63  ;;  %v2245_v54 = vpop.f32.mrf.mxu0 }
 0x16c   : > { %v1649_v52 = vadd.f32 %v2915_v29, %v1626_v4  ;;  %v1462_v39 = vpop.f32.mrf.mxu1  ;;  %v1735_v5 = vadd.f32 %v1734_v50, %v1733_v11  ;;  %v1682_v59 = vadd.f32 %v1681_v10, %v1680_v17  ;;  %v1683_v44 = vsel %vm1655_vm4, %v1645_v1, 0.0 }
 0x16d   : > { %v1647_v60 = vadd.f32 %v2915_v29, %v1624_v22  ;;  %v1627_v61 = vadd.f32 %v2242_v35, %v1501_v49  ;;  %v1736_v62 = vsel %vm1655_vm4, %v1716_v32, 0.0  ;;  %v1499_v53 = vadd.f32 %v1462_v39, %v2951_v23  ;;  %v1601_v28 = vpop.f32.mrf.mxu0 }
 0x16e   : > { %1666 = vst.msk [vmem:[%s2926_s10 + $0x50] sm:$0xff] %vm1655_vm4, %v1649_v52  ;;  %v2227_v43 = vpop.f32.mrf.mxu1  ;;  %v1684_v0 = vadd.f32 %v1683_v44, %v1682_v59  ;;  %v1737_v19 = vadd.f32 %v1736_v62, %v1735_v5  ;;  %v1740_v23 = vsel %vm1655_vm4, %v1718_v31, 0.0  ;;  %v1721_v36 = vmul.f32 %v1649_v52, %v1649_v52 }
 0x16f   : > { %1664 = vst.msk [vmem:[%s2926_s10 + $0x40] sm:$0xff] %vm1655_vm4, %v1647_v60  ;;  %v1719_v2 = vmul.f32 %v1647_v60, %v1647_v60  ;;  %v1650_v12 = vadd.f32 %v2915_v29, %v1627_v61  ;;  %v1625_v1 = vadd.f32 %v1588_v40, %v1499_v53  ;;  %v1504_v9 = vadd.f32 %v2227_v43, %v2954_v45  ;;  %v2246_v48 = vpop.f32.mrf.mxu0 }
 0x170   : > { %v1475_v7 = vpop.f32.mrf.mxu1  ;;  %v1739_v15 = vadd.f32 %v1738_v46, %v1737_v19  ;;  %v1686_v25 = vadd.f32 %v1685_v30, %v1684_v0  ;;  %v1687_v56 = vsel %vm1655_vm4, %v1647_v60, 0.0  ;;  %v1691_v18 = vsel %vm1655_vm4, %v1649_v52, 0.0 }
 0x171   : > { %v1502_v21 = vadd.f32 %v1475_v7, %v2957_v13  ;;  %1667 = vst.msk [vmem:[%s2926_s10 + $0x58] sm:$0xff] %vm1655_vm4, %v1650_v12  ;;  %v1648_v47 = vadd.f32 %v2915_v29, %v1625_v1  ;;  %v1630_v34 = vadd.f32 %v2245_v54, %v1504_v9  ;;  %v1742_v26 = vsel %vm1655_vm4, %v1719_v2, 0.0  ;;  %v1604_v63 = vpop.f32.mrf.mxu0 }
 0x172   : > { %v2228_v14 = vpop.f32.mrf.mxu1  ;;  %v1688_v20 = vadd.f32 %v1687_v56, %v1686_v25  ;;  %v1741_v16 = vadd.f32 %v1740_v23, %v1739_v15  ;;  %v1746_v37 = vsel %vm1655_vm4, %v1721_v36, 0.0  ;;  %v1693_v4 = vsel %vm1655_vm4, %v1650_v12, 0.0 }
 0x173   : > { %v1628_v45 = vadd.f32 %v1601_v28, %v1502_v21  ;;  %v1505_v41 = vadd.f32 %v2228_v14, %v2960_v58  ;;  %1665 = vst.msk [vmem:[%s2926_s10 + $0x48] sm:$0xff] %vm1655_vm4, %v1648_v47  ;;  %v1689_v13 = vsel %vm1655_vm4, %v1648_v47, 0.0  ;;  %v1720_v6 = vmul.f32 %v1648_v47, %v1648_v47 }
 0x174   : > { %v1653_v27 = vadd.f32 %v2915_v29, %v1630_v34  ;;  %v1478_v51 = vpop.f32.mrf.mxu1  ;;  %v1743_v55 = vadd.f32 %v1742_v26, %v1741_v16  ;;  %v1690_v33 = vadd.f32 %v1689_v13, %v1688_v20  ;;  %v1722_v58 = vmul.f32 %v1650_v12, %v1650_v12 }
 0x175   : > { %v1651_v3 = vadd.f32 %v2915_v29, %v1628_v45  ;;  %v1631_v35 = vadd.f32 %v2246_v48, %v1505_v41  ;;  %v1744_v57 = vsel %vm1655_vm4, %v1720_v6, 0.0  ;;  %v1503_v24 = vadd.f32 %v1478_v51, %v1371_v8 }
 0x176   : > { %1670 = vst.msk [vmem:[%s2926_s10 + $0x70] sm:$0xff] %vm1655_vm4, %v1653_v27  ;;  %v1692_v42 = vadd.f32 %v1691_v18, %v1690_v33  ;;  %v1745_v50 = vadd.f32 %v1744_v57, %v1743_v55  ;;  %v1748_v49 = vsel %vm1655_vm4, %v1722_v58, 0.0  ;;  %v1725_v39 = vmul.f32 %v1653_v27, %v1653_v27 }
 0x177   : > { %1668 = vst.msk [vmem:[%s2926_s10 + $0x60] sm:$0xff] %vm1655_vm4, %v1651_v3  ;;  %v1723_v38 = vmul.f32 %v1651_v3, %v1651_v3  ;;  %v1654_v40 = vadd.f32 %v2915_v29, %v1631_v35  ;;  %v1629_v17 = vadd.f32 %v1604_v63, %v1503_v24  ;;  %v1695_v31 = vsel %vm1655_vm4, %v1651_v3, 0.0 }
 0x178   : > { %v1747_v11 = vadd.f32 %v1746_v37, %v1745_v50  ;;  %v1694_v22 = vadd.f32 %v1693_v4, %v1692_v42  ;;  %v1699_v8 = vsel %vm1655_vm4, %v1653_v27, 0.0 }
 0x179   : > { %1671 = vst.msk [vmem:[%s2926_s10 + $0x78] sm:$0xff] %vm1655_vm4, %v1654_v40  ;;  %v1652_v10 = vadd.f32 %v2915_v29, %v1629_v17  ;;  %v1750_v54 = vsel %vm1655_vm4, %v1723_v38, 0.0  ;;  %v1726_v44 = vmul.f32 %v1654_v40, %v1654_v40  ;;  %v1754_v29 = vsel %vm1655_vm4, %v1725_v39, 0.0 }
 0x17a   : > { %v1696_v32 = vadd.f32 %v1695_v31, %v1694_v22  ;;  %v1749_v52 = vadd.f32 %v1748_v49, %v1747_v11  ;;  %v1701_v46 = vsel %vm1655_vm4, %v1654_v40, 0.0 }
 0x17b   : > { %1669 = vst.msk [vmem:[%s2926_s10 + $0x68] sm:$0xff] %vm1655_vm4, %v1652_v10  ;;  %v1697_v5 = vsel %vm1655_vm4, %v1652_v10, 0.0  ;;  %v1724_v59 = vmul.f32 %v1652_v10, %v1652_v10  ;;  %v1756_v19 = vsel %vm1655_vm4, %v1726_v44, 0.0 }
 0x17c   : > { %v1751_v60 = vadd.f32 %v1750_v54, %v1749_v52  ;;  %v1698_v61 = vadd.f32 %v1697_v5, %v1696_v32 }
 0x17d   : > { %v1752_v62 = vsel %vm1655_vm4, %v1724_v59, 0.0 }
 0x17e   : > { %v1700_v53 = vadd.f32 %v1699_v8, %v1698_v61  ;;  %v1753_v43 = vadd.f32 %v1752_v62, %v1751_v60 }
 0x180   : > { %v1702_v30 = vadd.f32 %v1701_v46, %v1700_v53  ;;  %v1755_v0 = vadd.f32 %v1754_v29, %v1753_v43 }
 0x182   : > { %v1703_v28 = vrot.slane %v1702_v30, 4  ;;  %v1757_v2 = vadd.f32 %v1756_v19, %v1755_v0 }
 0x184   : > { %v1704_v12 = vadd.f32 %v1703_v28, %v1702_v30  ;;  %v1758_v1 = vrot.slane %v1757_v2, 4 }
 0x186   : > { %v1705_v9 = vrot.slane %v1704_v12, 2  ;;  %v1759_v7 = vadd.f32 %v1758_v1, %v1757_v2 }
 0x188   : > { %v1706_v23 = vadd.f32 %v1705_v9, %v1704_v12  ;;  %v1760_v15 = vrot.slane %v1759_v7, 2 }
 0x18a   : > { %v1707_v25 = vrot.slane %v1706_v23, 1  ;;  %v1761_v21 = vadd.f32 %v1760_v15, %v1759_v7 }
 0x18c   : > { %v1708_v36 = vadd.f32 %v1707_v25, %v1706_v23  ;;  %v1762_v56 = vrot.slane %v1761_v21, 1 }
 0x18e   : > { %1710 = vst.msk [vmem:[%s288_s13] sm:$0x1] %vm1709_vm5, %v1708_v36  ;;  %v1763_v47 = vadd.f32 %v1762_v56, %v1761_v21 }
 0x190   : > { %1764 = vst.msk [vmem:[%s295_s16] sm:$0x1] %vm1709_vm5, %v1763_v47 }
 0x191 PF: > { %s16_s22 = sadd.s32 1, %s2338_s22   ;;  %s3109_s18 = smov %s2330_s20 }
 0x192   : > { %p13_p6 = scmp.ge.s32.totalorder %s16_s22, 6   ;;  %s3110_s19 = smov %s2334_s21 }
 0x193   : > { %s3111_s20 = smov %s3114_s23  ;;  %s3112_s21 = smov %s3118_s24 }
 0x194   :  { %15 = sbr.rel (!%p13_p6) target bundleno = 3 (0x3), region = 94 }

</bundles_post_ra>
